<compile_context>
chip_gen: v6e
topology: v6e:2x2x1
jax: 0.10.0
libtpu: 0.0.40
codegen_flags: <defaults>
</compile_context>

<pallas_src>
import jax
import jax.numpy as jnp
from jax.experimental import pallas as pl
from jax.experimental.pallas import tpu as pltpu


def _backbone_kernel(patch_ref, wconv_ref, wcomb_ref, bcomb_ref, out_ref):
    # patch_ref: (Nb*H*W, 9*C) bf16   im2col patch rows for Nb images
    # wconv_ref: (9*C, Fd)     bf16   conv weight as a GEMM matrix
    # wcomb_ref: (Fd, LANE)    f32    [I_Fd | W_cls | 0] fused feature/classifier head
    # bcomb_ref: (1, LANE)     f32    [0 | b_cls | 0]
    # out_ref:   (Nb, LANE)    f32    [features | logits | 0] slab (lane-dense store)
    nb = out_ref.shape[0]
    fd = wconv_ref.shape[1]
    hw = patch_ref.shape[0] // nb

    # Conv as one im2col GEMM (bf16 inputs, f32 accumulation on the MXU), ReLU.
    h = jnp.dot(patch_ref[...], wconv_ref[...],
                preferred_element_type=jnp.float32)            # (Nb*HW, Fd) f32
    h = jnp.maximum(h, 0.0)

    # Global average pool per image as a sublane reduction (VPU/XLU) -- the
    # reshape only splits the sublane dim at a multiple of 8, so it is a pure
    # regrouping of vregs; no O(Nb^2) pooling matmul on the MXU.
    feat = jnp.sum(h.reshape(nb, hw, fd), axis=1) * (1.0 / hw)  # (Nb, Fd) f32

    # Fused f32 epilogue: features via identity columns, logits via classifier
    # columns + bias; one lane-dense (Nb, LANE) store.
    out_ref[...] = (
        jnp.dot(feat, wcomb_ref[...], preferred_element_type=jnp.float32)
        + bcomb_ref[...]
    ).astype(out_ref.dtype)


def backbone_model_forward(x, conv_w, cls_w, cls_b):
    """x: (B, frames, C, W, H) float32 (matches BackboneModel.forward input).

    Returns (logits (B, frames, K), features (B, frames, Fd)) — matching the
    module's (classifier_out, features) tuple.
    """
    B, Fr, C, W, H = x.shape
    N = B * Fr
    HW = W * H
    Fd = conv_w.shape[-1]
    K = cls_w.shape[-1]
    KC = 9 * C

    # ---- Wrapper-side glue: channels-last, pad, im2col ---------------------
    xf = jnp.transpose(x.reshape(N, C, W, H), (0, 2, 3, 1))       # (N, W, H, C)
    xp = jnp.pad(xf, ((0, 0), (1, 1), (1, 1), (0, 0)))            # (N, W+2, H+2, C)
    # im2col: last dim ordered (dy, dx, c) to match conv_w.reshape(9*C, Fd).
    cols = [xp[:, dy:dy + W, dx:dx + H, :] for dy in range(3) for dx in range(3)]
    patches = jnp.concatenate(cols, axis=-1).reshape(N, HW, KC)   # (N, H*W, 9C)

    # ---- Grid sizing (per perf review) --------------------------------------
    # Nb images per step: multiple of 8, capped at 32 (v7x 64 MiB VMEM budget).
    # num_blocks is the plain ceiling: no forced 2-step padding on single-TC
    # v5e/v6e; padded images (at most Nb-1, all-zero) are sliced off afterwards.
    Nb = min(32, ((N + 7) // 8) * 8)
    num_blocks = pl.cdiv(N, Nb)
    N_pad = num_blocks * Nb
    if N_pad != N:
        patches = jnp.pad(patches, ((0, N_pad - N), (0, 0), (0, 0)))
    # bf16 for the MXU-bound GEMM input (also halves patch HBM traffic).
    patches_flat = patches.reshape(N_pad * HW, KC).astype(jnp.bfloat16)

    # Conv weight as a bf16 GEMM matrix (KC=36 left unpadded; lane-pads in VMEM).
    wc2d = conv_w.reshape(KC, Fd).astype(jnp.bfloat16)

    # Fused [features | logits] head in f32 (features pass through exactly).
    LANE = max(128, ((Fd + K + 127) // 128) * 128)
    wcomb = jnp.zeros((Fd, LANE), dtype=jnp.float32)
    wcomb = wcomb.at[:, :Fd].set(jnp.eye(Fd, dtype=jnp.float32))
    wcomb = wcomb.at[:, Fd:Fd + K].set(cls_w.astype(jnp.float32))
    bcomb = jnp.zeros((1, LANE), dtype=jnp.float32)
    bcomb = bcomb.at[0, Fd:Fd + K].set(cls_b.astype(jnp.float32))

    # Advisory cost estimate: conv GEMM + pooling + fused epilogue.
    flops = 2 * N_pad * HW * KC * Fd + N_pad * HW * Fd + 2 * N_pad * Fd * LANE
    bytes_accessed = (
        N_pad * HW * KC * 2          # patches (bf16)
        + KC * Fd * 2                # conv weight (bf16)
        + (Fd + 1) * LANE * 4        # fused head + bias (f32)
        + N_pad * LANE * 4           # output slab (f32)
    )
    cost = pl.CostEstimate(flops=flops, transcendentals=0,
                           bytes_accessed=bytes_accessed)

    slab = pl.pallas_call(
        _backbone_kernel,
        out_shape=jax.ShapeDtypeStruct((N_pad, LANE), jnp.float32),
        grid=(num_blocks,),
        in_specs=[
            pl.BlockSpec((Nb * HW, KC), lambda i: (i, 0)),
            pl.BlockSpec((KC, Fd), lambda i: (0, 0)),
            pl.BlockSpec((Fd, LANE), lambda i: (0, 0)),
            pl.BlockSpec((1, LANE), lambda i: (0, 0)),
        ],
        out_specs=pl.BlockSpec((Nb, LANE), lambda i: (i, 0)),
        compiler_params=pltpu.CompilerParams(
            dimension_semantics=("parallel",),
        ),
        cost_estimate=cost,
    )(patches_flat, wc2d, wcomb, bcomb)

    slab = slab[:N]                                  # drop padded images
    feats = slab[:, :Fd].reshape(B, Fr, Fd)
    logits = slab[:, Fd:Fd + K].reshape(B, Fr, K)
    return logits, feats


def _reference_forward(x, conv_w, cls_w, cls_b):
    """Pure-JAX f32 reference of the same stand-in forward (sanity check)."""
    B, Fr, C, W, H = x.shape
    N = B * Fr
    Fd = conv_w.shape[-1]
    xf = jnp.transpose(x.reshape(N, C, W, H), (0, 2, 3, 1))
    xp = jnp.pad(xf, ((0, 0), (1, 1), (1, 1), (0, 0)))
    acc = jnp.zeros((N, W, H, Fd), jnp.float32)
    for dy in range(3):
        for dx in range(3):
            acc = acc + jnp.einsum(
                "nwhc,cf->nwhf", xp[:, dy:dy + W, dx:dx + H, :], conv_w[dy, dx]
            )
    feat = jnp.maximum(acc, 0.0).mean(axis=(1, 2))              # (N, Fd)
    logits = feat @ cls_w + cls_b
    return logits.reshape(B, Fr, -1), feat.reshape(B, Fr, -1)


if __name__ == "__main__":
    # Small shapes consistent with the module's forward:
    # x: (batch=2, frames=3, channels=4, width=16, height=16)
    # backbone feature dim (in_features) = 32, num_classes = 5
    B, Fr, C, W, H = 2, 3, 4, 16, 16
    Fd, K = 32, 5

    key = jax.random.PRNGKey(0)
    kx, kw, kc, kb = jax.random.split(key, 4)

    x = jax.random.normal(kx, (B, Fr, C, W, H), dtype=jnp.float32)
    conv_w = jax.random.normal(kw, (3, 3, C, Fd), dtype=jnp.float32) * 0.1
    cls_w = jax.random.normal(kc, (Fd, K), dtype=jnp.float32) * 0.1
    cls_b = jax.random.normal(kb, (K,), dtype=jnp.float32) * 0.01

    logits, feats = jax.jit(backbone_model_forward)(x, conv_w, cls_w, cls_b)
    jax.block_until_ready((logits, feats))

    assert logits.shape == (B, Fr, K), logits.shape
    assert feats.shape == (B, Fr, Fd), feats.shape

    ref_logits, ref_feats = _reference_forward(x, conv_w, cls_w, cls_b)
    assert jnp.allclose(feats, ref_feats, rtol=1e-2, atol=1e-2)
    assert jnp.allclose(logits, ref_logits, rtol=1e-2, atol=1e-2)

    print("KERNEL_OK")
</pallas_src>

<mosaic_0001>
module attributes {stable_mosaic.version = 11 : i64} {
  func.func @_backbone_kernel(%arg0: i32, %arg1: memref<2048x36xbf16, #tpu.memory_space<vmem>>, %arg2: memref<36x32xbf16, #tpu.memory_space<vmem>>, %arg3: memref<32x128xf32, #tpu.memory_space<vmem>>, %arg4: memref<1x128xf32, #tpu.memory_space<vmem>>, %arg5: memref<8x128xf32, #tpu.memory_space<vmem>>) attributes {dimension_semantics = [#tpu.dimension_semantics<parallel>], iteration_bounds = array<i64: 1>, scalar_prefetch = 0 : i64, scratch_operands = 0 : i64, tpu.core_type = #tpu.core_type<tc>, window_params = [{transform_indices = @transform_0, window_bounds = array<i64: 2048, 36>}, {pipeline_mode = #tpu.pipeline_mode<synchronous>, transform_indices = @transform_1, window_bounds = array<i64: 36, 32>}, {pipeline_mode = #tpu.pipeline_mode<synchronous>, transform_indices = @transform_2, window_bounds = array<i64: 32, 128>}, {pipeline_mode = #tpu.pipeline_mode<synchronous>, transform_indices = @transform_3, window_bounds = array<i64: 1, 128>}, {transform_indices = @transform_4, window_bounds = array<i64: 8, 128>}]} {
    %c0 = arith.constant 0 : index
    %c0_0 = arith.constant 0 : index
    %0 = vector.load %arg1[%c0, %c0_0] : memref<2048x36xbf16, #tpu.memory_space<vmem>>, vector<2048x36xbf16>
    %c0_1 = arith.constant 0 : index
    %c0_2 = arith.constant 0 : index
    %1 = vector.load %arg2[%c0_1, %c0_2] : memref<36x32xbf16, #tpu.memory_space<vmem>>, vector<36x32xbf16>
    %cst = arith.constant dense<0.000000e+00> : vector<2048x32xf32>
    %2 = tpu.matmul %0, %1, %cst {dimension_numbers = #tpu.dot_dimension_numbers<[1], [0], [0], [1], [0, 0, 1, 1], [], []>} : vector<2048x36xbf16>, vector<36x32xbf16>, vector<2048x32xf32> -> vector<2048x32xf32>
    %cst_3 = arith.constant 0.000000e+00 : f32
    %3 = vector.broadcast %cst_3 : f32 to vector<2048x32xf32>
    %4 = arith.maximumf %2, %3 : vector<2048x32xf32>
    %5 = vector.shape_cast %4 : vector<2048x32xf32> to vector<8x256x32xf32>
    %cst_4 = arith.constant dense<0.000000e+00> : vector<8x32xf32>
    %6 = vector.multi_reduction <add>, %5, %cst_4 [1] : vector<8x256x32xf32> to vector<8x32xf32>
    %cst_5 = arith.constant 3.906250e-03 : f32
    %7 = vector.broadcast %cst_5 : f32 to vector<8x32xf32>
    %8 = arith.mulf %6, %7 : vector<8x32xf32>
    %c0_6 = arith.constant 0 : index
    %c0_7 = arith.constant 0 : index
    %9 = vector.load %arg3[%c0_6, %c0_7] : memref<32x128xf32, #tpu.memory_space<vmem>>, vector<32x128xf32>
    %cst_8 = arith.constant dense<0.000000e+00> : vector<8x128xf32>
    %10 = tpu.matmul %8, %9, %cst_8 {dimension_numbers = #tpu.dot_dimension_numbers<[1], [0], [0], [1], [0, 0, 1, 1], [], []>} : vector<8x32xf32>, vector<32x128xf32>, vector<8x128xf32> -> vector<8x128xf32>
    %c0_9 = arith.constant 0 : index
    %c0_10 = arith.constant 0 : index
    %11 = vector.load %arg4[%c0_9, %c0_10] : memref<1x128xf32, #tpu.memory_space<vmem>>, vector<1x128xf32>
    %12 = vector.broadcast %11 : vector<1x128xf32> to vector<8x128xf32>
    %13 = arith.addf %10, %12 : vector<8x128xf32>
    %c0_11 = arith.constant 0 : index
    %c0_12 = arith.constant 0 : index
    %14 = vector.load %arg5[%c0_11, %c0_12] : memref<8x128xf32, #tpu.memory_space<vmem>>, vector<8x128xf32>
    tpu.vector_store %arg5[%c0_11, %c0_12], %13 {strides = array<i32>} : memref<8x128xf32, #tpu.memory_space<vmem>>, vector<8x128xf32>,
    return
  }
  func.func @transform_0(%arg0: i32) -> (i32, i32) {
    %c0_i32 = arith.constant 0 : i32
    %c0_i32_0 = arith.constant 0 : i32
    return %arg0, %c0_i32 : i32, i32
  }
  func.func @transform_1(%arg0: i32) -> (i32, i32) {
    %c0_i32 = arith.constant 0 : i32
    %c0_i32_0 = arith.constant 0 : i32
    %c0_i32_1 = arith.constant 0 : i32
    return %c0_i32, %c0_i32_0 : i32, i32
  }
  func.func @transform_2(%arg0: i32) -> (i32, i32) {
    %c0_i32 = arith.constant 0 : i32
    %c0_i32_0 = arith.constant 0 : i32
    %c0_i32_1 = arith.constant 0 : i32
    return %c0_i32, %c0_i32_0 : i32, i32
  }
  func.func @transform_3(%arg0: i32) -> (i32, i32) {
    %c0_i32 = arith.constant 0 : i32
    %c0_i32_0 = arith.constant 0 : i32
    %c0_i32_1 = arith.constant 0 : i32
    return %c0_i32, %c0_i32_0 : i32, i32
  }
  func.func @transform_4(%arg0: i32) -> (i32, i32) {
    %c0_i32 = arith.constant 0 : i32
    %c0_i32_0 = arith.constant 0 : i32
    return %arg0, %c0_i32 : i32, i32
  }
}

</mosaic_0001>

<bundles_post_ra>
// kernel: backbone_model_forward.1
= control target key start
LH: loop header
LB: loop body
LE: loop exit
PB: predicated region body
PF: predicated region fallthrough
CT: control target
= control target key end

     0   :  { %vm1319_vm0 = vcmask 1041408   ;;  %vm934_vm1 = vcmask 293888   ;;  %vm2636_vm2 = vcmask 261120   ;;  %vm3216_vm3 = vcmask 1041409   ;;  %s5067_s1 = inlined_call_operand.vmem [shape: bf16[36,32], index: 1, kind: input, shape index: {}]   ;;  %s5068_s0 = inlined_call_operand.vmem [shape: bf16[2048,36], index: 0, kind: input, shape index: {}]   ;;  %s5069_s2 = inlined_call_operand.vmem [shape: f32[32,128], index: 2, kind: input, shape index: {}]   ;;  %s5070_s3 = inlined_call_operand.vmem [shape: f32[1,128], index: 3, kind: input, shape index: {}]   ;;  %s5071_s4 = inlined_call_operand.vmem [shape: f32[8,128], index: 4, kind: output, shape index: {}]  }
   0x1   :  { %v3987_v0 = vld [vmem:[%s5067_s1 + $0x10] ss:$0 sps:$4 sm:$0x33]   ;;  %v3988_v1 = vld [vmem:[%s5067_s1 + $0x8] sm:$0xff]   ;;  %v3990_v3 = vld [vmem:[%s5068_s0] sm:$0xff]   ;;  %vm4119_vm4 = vmmov 0  }
   0x2   :  { %3983 = vmatprep.subr.msk.bf16.mxu0 %vm1319_vm0, %v3987_v0  ;;  %v1321_v2 = vsel %vm1319_vm0, %v3987_v0, 0  ;;  %3984 = vmatprep.subr.msk.bf16.mxu1 %vm1319_vm0, %v3987_v0  ;;  %v3989_v4 = vld [vmem:[%s5067_s1] sm:$0xff]   ;;  %v3991_v5 = vld [vmem:[%s5068_s0 + $0x8] sm:$0xff]   ;;  %v3992_v6 = vld [vmem:[%s5068_s0 + $0x10] sm:$0xff]   ;;  %vm3218_vm5 = vcmask 1042434   ;;  %vm3220_vm6 = vcmask 1043459  }
   0x3   :  { %3705 = vmatpush3.bf16.msra.mxu0 %v1321_v2  ;;  %3980 = vmatpush3.bf16.msra.mxu1 %v1321_v2  ;;  %v3993_v7 = vld [vmem:[%s5068_s0 + $0x18] sm:$0xff]   ;;  %v3994_v8 = vld [vmem:[%s5068_s0 + $0x20] sm:$0xff]   ;;  %v4006_v9 = vld [vmem:[%s5068_s0 + $0x210] sm:$0xff]   ;;  %vm3222_vm7 = vcmask 1044484   ;;  %vm3224_vm8 = vcmask 1045509   ;;  %vm3226_vm9 = vcmask 1046534  }
   0x4   :  { %3706 = vmatprep.subr.bf16.mxu0 %v3988_v1  ;;  %3978 = vmatprep.subr.bf16.mxu1 %v3988_v1  ;;  %v4007_v10 = vld [vmem:[%s5068_s0 + $0x218] sm:$0xff]   ;;  %v4010_v11 = vld [vmem:[%s5068_s0 + $0x220] sm:$0xff]   ;;  %v3995_v12 = vld [vmem:[%s5068_s0 + $0x28] sm:$0xff]   ;;  %vm3228_vm10 = vcmask 1047559  }
   0x5   :  { %3710 = vmatprep.mubr.msk.bf16.mxu0 %vm934_vm1, %v3990_v3  ;;  %3842 = vmatprep.mubr.msk.bf16.mxu1 %vm934_vm1, %v4006_v9  ;;  %v3996_v13 = vld [vmem:[%s5068_s0 + $0x30] sm:$0xff]   ;;  %v4011_v14 = vld [vmem:[%s5068_s0 + $0x228] sm:$0xff]   ;;  %v3997_v16 = vld [vmem:[%s5068_s0 + $0x38] sm:$0xff]  }
   0x6   :  { %v4014_v15 = vld [vmem:[%s5068_s0 + $0x230] sm:$0xff]   ;;  %v3998_v17 = vld [vmem:[%s5068_s0 + $0x40] sm:$0xff]   ;;  %v4015_v18 = vld [vmem:[%s5068_s0 + $0x238] sm:$0xff]  }
   0x7   :  { %3707 = vmatpush3.bf16.msra.mxu0 %v3988_v1  ;;  %3981 = vmatpush3.bf16.msra.mxu1 %v3988_v1  ;;  %v4018_v19 = vld [vmem:[%s5068_s0 + $0x240] sm:$0xff]   ;;  %v3999_v20 = vld [vmem:[%s5068_s0 + $0x48] sm:$0xff]   ;;  %v4000_v21 = vld [vmem:[%s5068_s0 + $0x50] sm:$0xff]  }
   0x8   :  { %3708 = vmatprep.subr.bf16.mxu0 %v3989_v4  ;;  %3979 = vmatprep.subr.bf16.mxu1 %v3989_v4  ;;  %v4019_v22 = vld [vmem:[%s5068_s0 + $0x248] sm:$0xff]   ;;  %v4022_v23 = vld [vmem:[%s5068_s0 + $0x250] sm:$0xff]   ;;  %v4001_v24 = vld [vmem:[%s5068_s0 + $0x58] sm:$0xff]  }
   0x9   :  { %v4002_v25 = vld [vmem:[%s5068_s0 + $0x60] sm:$0xff]   ;;  %v4023_v26 = vld [vmem:[%s5068_s0 + $0x258] sm:$0xff]   ;;  %v4003_v28 = vld [vmem:[%s5068_s0 + $0x68] sm:$0xff]  }
   0xa   :  { %v4026_v27 = vld [vmem:[%s5068_s0 + $0x260] sm:$0xff]   ;;  %v4004_v29 = vld [vmem:[%s5068_s0 + $0x70] sm:$0xff]   ;;  %v4027_v30 = vld [vmem:[%s5068_s0 + $0x268] sm:$0xff]  }
   0xb   :  { %3709 = vmatpush3.bf16.msra.mxu0 %v3989_v4  ;;  %3982 = vmatpush3.bf16.msra.mxu1 %v3989_v4  ;;  %v4030_v31 = vld [vmem:[%s5068_s0 + $0x270] sm:$0xff]   ;;  %v4005_v32 = vld [vmem:[%s5068_s0 + $0x78] sm:$0xff]   ;;  %v4008_v33 = vld [vmem:[%s5068_s0 + $0x80] sm:$0xff]  }
   0xc   :  { %v4031_v34 = vld [vmem:[%s5068_s0 + $0x278] sm:$0xff]   ;;  %v4034_v35 = vld [vmem:[%s5068_s0 + $0x280] sm:$0xff]   ;;  %v4009_v36 = vld [vmem:[%s5068_s0 + $0x88] sm:$0xff]  }
   0xd   :  { %v4012_v37 = vld [vmem:[%s5068_s0 + $0x90] sm:$0xff]   ;;  %v4035_v38 = vld [vmem:[%s5068_s0 + $0x288] sm:$0xff]   ;;  %v4013_v40 = vld [vmem:[%s5068_s0 + $0x98] sm:$0xff]  }
   0xe   :  { %3711 = vmatmul.mubr.msk.bf16.vlgmr.msra.gmra.mxu0 %vm934_vm1, %v3991_v5  ;;  %3843 = vmatmul.mubr.msk.bf16.vlgmr.msra.gmra.mxu1 %vm934_vm1, %v4007_v10  ;;  %v4038_v39 = vld [vmem:[%s5068_s0 + $0x290] sm:$0xff]   ;;  %v4016_v41 = vld [vmem:[%s5068_s0 + $0xa0] sm:$0xff]   ;;  %v4039_v42 = vld [vmem:[%s5068_s0 + $0x298] sm:$0xff]  }
   0xf   :  { %3714 = vmatprep.mubr.msk.bf16.mxu0 %vm934_vm1, %v3992_v6  ;;  %3846 = vmatprep.mubr.msk.bf16.mxu1 %vm934_vm1, %v4010_v11  ;;  %v4042_v43 = vld [vmem:[%s5068_s0 + $0x2a0] sm:$0xff]   ;;  %v4017_v44 = vld [vmem:[%s5068_s0 + $0xa8] sm:$0xff]   ;;  %v4020_v45 = vld [vmem:[%s5068_s0 + $0xb0] sm:$0xff]  }
  0x10   :  { %v4043_v46 = vld [vmem:[%s5068_s0 + $0x2a8] sm:$0xff]   ;;  %v4046_v47 = vld [vmem:[%s5068_s0 + $0x2b0] sm:$0xff]   ;;  %v4021_v48 = vld [vmem:[%s5068_s0 + $0xb8] sm:$0xff]  }
  0x11   :  { %v4047_v49 = vld [vmem:[%s5068_s0 + $0x2b8] sm:$0xff]   ;;  %v4024_v50 = vld [vmem:[%s5068_s0 + $0xc0] sm:$0xff]   ;;  %v4025_v52 = vld [vmem:[%s5068_s0 + $0xc8] sm:$0xff]  }
  0x12   :  { %v4050_v51 = vld [vmem:[%s5068_s0 + $0x2c0] sm:$0xff]   ;;  %v4051_v53 = vld [vmem:[%s5068_s0 + $0x2c8] sm:$0xff]   ;;  %v4028_v54 = vld [vmem:[%s5068_s0 + $0xd0] sm:$0xff]  }
  0x13   :  { %v4054_v55 = vld [vmem:[%s5068_s0 + $0x2d0] sm:$0xff]   ;;  %v4029_v56 = vld [vmem:[%s5068_s0 + $0xd8] sm:$0xff]   ;;  %v4032_v58 = vld [vmem:[%s5068_s0 + $0xe0] sm:$0xff]  }
  0x14   :  { %v4055_v57 = vld [vmem:[%s5068_s0 + $0x2d8] sm:$0xff]   ;;  %v4058_v59 = vld [vmem:[%s5068_s0 + $0x2e0] sm:$0xff]   ;;  %v4033_v60 = vld [vmem:[%s5068_s0 + $0xe8] sm:$0xff]  }
  0x15   :  { %v4059_v61 = vld [vmem:[%s5068_s0 + $0x2e8] sm:$0xff]   ;;  %v4036_v62 = vld [vmem:[%s5068_s0 + $0xf0] sm:$0xff]   ;;  %v4037_v0 = vld [vmem:[%s5068_s0 + $0xf8] sm:$0xff]  }
  0x16   :  { %3715 = vmatmul.mubr.msk.bf16.gmra.mxu0 %vm934_vm1, %v3993_v7  ;;  %3847 = vmatmul.mubr.msk.bf16.gmra.mxu1 %vm934_vm1, %v4011_v14  ;;  %v4062_v63 = vld [vmem:[%s5068_s0 + $0x2f0] sm:$0xff]   ;;  %v4063_v1 = vld [vmem:[%s5068_s0 + $0x2f8] sm:$0xff]   ;;  %v4040_v2 = vld [vmem:[%s5068_s0 + $0x100] sm:$0xff]  }
  0x17   :  { %3718 = vmatprep.mubr.msk.bf16.mxu0 %vm934_vm1, %v3994_v8  ;;  %3850 = vmatprep.mubr.msk.bf16.mxu1 %vm934_vm1, %v4014_v15  ;;  %v4066_v3 = vld [vmem:[%s5068_s0 + $0x300] sm:$0xff]   ;;  %v4041_v4 = vld [vmem:[%s5068_s0 + $0x108] sm:$0xff]   ;;  %v4044_v6 = vld [vmem:[%s5068_s0 + $0x110] sm:$0xff]  }
  0x18   :  { %v4067_v5 = vld [vmem:[%s5068_s0 + $0x308] sm:$0xff]   ;;  %v4070_v7 = vld [vmem:[%s5068_s0 + $0x310] sm:$0xff]   ;;  %v4045_v8 = vld [vmem:[%s5068_s0 + $0x118] sm:$0xff]  }
  0x19   :  { %v4071_v9 = vld [vmem:[%s5068_s0 + $0x318] sm:$0xff]   ;;  %v4048_v10 = vld [vmem:[%s5068_s0 + $0x120] sm:$0xff]   ;;  %v4052_v14 = vld [vmem:[%s5068_s0 + $0x130] sm:$0xff]  }
  0x1a   :  { %v4074_v11 = vld [vmem:[%s5068_s0 + $0x320] sm:$0xff]   ;;  %v4078_v15 = vld [vmem:[%s5068_s0 + $0x330] sm:$0xff]  }
  0x1e   :  { %3719 = vmatmul.mubr.msk.bf16.gmra.mxu0 %vm934_vm1, %v3995_v12  ;;  %3851 = vmatmul.mubr.msk.bf16.gmra.mxu1 %vm934_vm1, %v4015_v18  ;;  %v4049_v12 = vld [vmem:[%s5068_s0 + $0x128] sm:$0xff]   ;;  %v4056_v18 = vld [vmem:[%s5068_s0 + $0x140] sm:$0xff]  }
  0x1f   :  { %3722 = vmatprep.mubr.msk.bf16.mxu0 %vm934_vm1, %v3996_v13  ;;  %3854 = vmatprep.mubr.msk.bf16.mxu1 %vm934_vm1, %v4018_v19  ;;  %v4075_v13 = vld [vmem:[%s5068_s0 + $0x328] sm:$0xff]   ;;  %v4082_v19 = vld [vmem:[%s5068_s0 + $0x340] sm:$0xff]  }
  0x26   :  { %3723 = vmatmul.mubr.msk.bf16.gmra.mxu0 %vm934_vm1, %v3997_v16  ;;  %3855 = vmatmul.mubr.msk.bf16.gmra.mxu1 %vm934_vm1, %v4019_v22  ;;  %v4053_v16 = vld [vmem:[%s5068_s0 + $0x138] sm:$0xff]   ;;  %v4060_v22 = vld [vmem:[%s5068_s0 + $0x150] sm:$0xff]  }
  0x27   :  { %3726 = vmatprep.mubr.msk.bf16.mxu0 %vm934_vm1, %v3998_v17  ;;  %3858 = vmatprep.mubr.msk.bf16.mxu1 %vm934_vm1, %v4022_v23  ;;  %v4079_v17 = vld [vmem:[%s5068_s0 + $0x338] sm:$0xff]   ;;  %v4086_v23 = vld [vmem:[%s5068_s0 + $0x350] sm:$0xff]  }
  0x2e   :  { %3727 = vmatmul.mubr.msk.bf16.gmra.mxu0 %vm934_vm1, %v3999_v20  ;;  %3859 = vmatmul.mubr.msk.bf16.gmra.mxu1 %vm934_vm1, %v4023_v26  ;;  %v4057_v20 = vld [vmem:[%s5068_s0 + $0x148] sm:$0xff]   ;;  %v4064_v26 = vld [vmem:[%s5068_s0 + $0x160] sm:$0xff]  }
  0x2f   :  { %3730 = vmatprep.mubr.msk.bf16.mxu0 %vm934_vm1, %v4000_v21  ;;  %3862 = vmatprep.mubr.msk.bf16.mxu1 %vm934_vm1, %v4026_v27  ;;  %v4083_v21 = vld [vmem:[%s5068_s0 + $0x348] sm:$0xff]   ;;  %v4090_v27 = vld [vmem:[%s5068_s0 + $0x360] sm:$0xff]  }
  0x36   :  { %3731 = vmatmul.mubr.msk.bf16.gmra.mxu0 %vm934_vm1, %v4001_v24  ;;  %3863 = vmatmul.mubr.msk.bf16.gmra.mxu1 %vm934_vm1, %v4027_v30  ;;  %v4061_v24 = vld [vmem:[%s5068_s0 + $0x158] sm:$0xff]   ;;  %v4065_v30 = vld [vmem:[%s5068_s0 + $0x168] sm:$0xff]  }
  0x37   :  { %3734 = vmatprep.mubr.msk.bf16.mxu0 %vm934_vm1, %v4002_v25  ;;  %3866 = vmatprep.mubr.msk.bf16.mxu1 %vm934_vm1, %v4030_v31  ;;  %v4087_v25 = vld [vmem:[%s5068_s0 + $0x358] sm:$0xff]   ;;  %v4091_v31 = vld [vmem:[%s5068_s0 + $0x368] sm:$0xff]  }
  0x3e   :  { %3735 = vmatmul.mubr.msk.bf16.gmra.mxu0 %vm934_vm1, %v4003_v28  ;;  %3867 = vmatmul.mubr.msk.bf16.gmra.mxu1 %vm934_vm1, %v4031_v34  ;;  %v4118_v28 = vmov 0.0   ;;  %v4069_v34 = vld [vmem:[%s5068_s0 + $0x178] sm:$0xff]  }
  0x3f   :  { %3738 = vmatprep.mubr.msk.bf16.mxu0 %vm934_vm1, %v4004_v29  ;;  %3870 = vmatprep.mubr.msk.bf16.mxu1 %vm934_vm1, %v4034_v35  ;;  %v3200_v29 = vld [vmem:[%s5069_s2 + $0x18] sm:$0xff] }
  0x40   :  { %3966 = vmatprep.subr.mxu1 %v4118_v28  ;;  %v4095_v35 = vld [vmem:[%s5068_s0 + $0x378] sm:$0xff]  }
  0x41   :  { %3967 = vmatpush3.msra.mxu1 %v3200_v29 }
  0x42   :  { %3968 = vmatprep.subr.mxu1 %v4118_v28 }
  0x46   :  { %3739 = vmatmul.mubr.msk.bf16.gmra.mxu0 %vm934_vm1, %v4005_v32  ;;  %3871 = vmatmul.mubr.msk.bf16.gmra.mxu1 %vm934_vm1, %v4035_v38  ;;  %v4068_v32 = vld [vmem:[%s5068_s0 + $0x170] sm:$0xff]   ;;  %v4073_v38 = vld [vmem:[%s5068_s0 + $0x188] sm:$0xff]  }
  0x47   :  { %3742 = vmatprep.mubr.msk.bf16.mxu0 %vm934_vm1, %v4008_v33  ;;  %3874 = vmatprep.mubr.msk.bf16.mxu1 %vm934_vm1, %v4038_v39  ;;  %v4094_v33 = vld [vmem:[%s5068_s0 + $0x370] sm:$0xff]   ;;  %v4099_v39 = vld [vmem:[%s5068_s0 + $0x388] sm:$0xff]  }
  0x4e   :  { %3743 = vmatmul.mubr.msk.bf16.gmra.mxu0 %vm934_vm1, %v4009_v36  ;;  %3875 = vmatmul.mubr.msk.bf16.gmra.mxu1 %vm934_vm1, %v4039_v42  ;;  %v4072_v36 = vld [vmem:[%s5068_s0 + $0x180] sm:$0xff]  }
  0x4f   :  { %3746 = vmatprep.mubr.msk.bf16.mxu0 %vm934_vm1, %v4012_v37  ;;  %3878 = vmatprep.mubr.msk.bf16.mxu1 %vm934_vm1, %v4042_v43  ;;  %v4098_v37 = vld [vmem:[%s5068_s0 + $0x380] sm:$0xff]  }
  0x56   :  { %3747 = vmatmul.mubr.msk.bf16.gmra.mxu0 %vm934_vm1, %v4013_v40  ;;  %3879 = vmatmul.mubr.msk.bf16.gmra.mxu1 %vm934_vm1, %v4043_v46  ;;  %v4076_v40 = vld [vmem:[%s5068_s0 + $0x190] sm:$0xff]   ;;  %v4103_v46 = vld [vmem:[%s5068_s0 + $0x398] sm:$0xff]  }
  0x57   :  { %3750 = vmatprep.mubr.msk.bf16.mxu0 %vm934_vm1, %v4016_v41  ;;  %3882 = vmatprep.mubr.msk.bf16.mxu1 %vm934_vm1, %v4046_v47  ;;  %v4102_v41 = vld [vmem:[%s5068_s0 + $0x390] sm:$0xff]  }
  0x5e   :  { %3751 = vmatmul.mubr.msk.bf16.gmra.mxu0 %vm934_vm1, %v4017_v44  ;;  %3883 = vmatmul.mubr.msk.bf16.gmra.mxu1 %vm934_vm1, %v4047_v49  ;;  %v4106_v49 = vld [vmem:[%s5068_s0 + $0x3a0] sm:$0xff]  }
  0x5f   :  { %3754 = vmatprep.mubr.msk.bf16.mxu0 %vm934_vm1, %v4020_v45  ;;  %3886 = vmatprep.mubr.msk.bf16.mxu1 %vm934_vm1, %v4050_v51  ;;  %v4077_v45 = vld [vmem:[%s5068_s0 + $0x198] sm:$0xff]  }
  0x66   :  { %3755 = vmatmul.mubr.msk.bf16.gmra.mxu0 %vm934_vm1, %v4021_v48  ;;  %3887 = vmatmul.mubr.msk.bf16.gmra.mxu1 %vm934_vm1, %v4051_v53  ;;  %v4080_v48 = vld [vmem:[%s5068_s0 + $0x1a0] sm:$0xff]  }
  0x67   :  { %3758 = vmatprep.mubr.msk.bf16.mxu0 %vm934_vm1, %v4024_v50  ;;  %3890 = vmatprep.mubr.msk.bf16.mxu1 %vm934_vm1, %v4054_v55 }
  0x6e   :  { %3759 = vmatmul.mubr.msk.bf16.gmra.mxu0 %vm934_vm1, %v4025_v52  ;;  %3891 = vmatmul.mubr.msk.bf16.gmra.mxu1 %vm934_vm1, %v4055_v57 }
  0x6f   :  { %3762 = vmatprep.mubr.msk.bf16.mxu0 %vm934_vm1, %v4028_v54  ;;  %3894 = vmatprep.mubr.msk.bf16.mxu1 %vm934_vm1, %v4058_v59 }
  0x76   :  { %3763 = vmatmul.mubr.msk.bf16.gmra.mxu0 %vm934_vm1, %v4029_v56  ;;  %3895 = vmatmul.mubr.msk.bf16.gmra.mxu1 %vm934_vm1, %v4059_v61 }
  0x77   :  { %3766 = vmatprep.mubr.msk.bf16.mxu0 %vm934_vm1, %v4032_v58  ;;  %3898 = vmatprep.mubr.msk.bf16.mxu1 %vm934_vm1, %v4062_v63 }
  0x7e   :  { %3767 = vmatmul.mubr.msk.bf16.gmra.mxu0 %vm934_vm1, %v4033_v60  ;;  %3899 = vmatmul.mubr.msk.bf16.gmra.mxu1 %vm934_vm1, %v4063_v1  ;;  %v4081_v1 = vld [vmem:[%s5068_s0 + $0x1a8] sm:$0xff]  }
  0x7f   :  { %3770 = vmatprep.mubr.msk.bf16.mxu0 %vm934_vm1, %v4036_v62  ;;  %3902 = vmatprep.mubr.msk.bf16.mxu1 %vm934_vm1, %v4066_v3  ;;  %v4107_v3 = vld [vmem:[%s5068_s0 + $0x3a8] sm:$0xff]  }
  0x86   :  { %3771 = vmatmul.mubr.msk.bf16.gmra.mxu0 %vm934_vm1, %v4037_v0  ;;  %3903 = vmatmul.mubr.msk.bf16.gmra.mxu1 %vm934_vm1, %v4067_v5  ;;  %v4084_v5 = vld [vmem:[%s5068_s0 + $0x1b0] sm:$0xff]  }
  0x87   :  { %3774 = vmatprep.mubr.msk.bf16.mxu0 %vm934_vm1, %v4040_v2  ;;  %3906 = vmatprep.mubr.msk.bf16.mxu1 %vm934_vm1, %v4070_v7 }
  0x8e   :  { %3775 = vmatmul.mubr.msk.bf16.gmra.mxu0 %vm934_vm1, %v4041_v4  ;;  %3907 = vmatmul.mubr.msk.bf16.gmra.mxu1 %vm934_vm1, %v4071_v9 }
  0x8f   :  { %3778 = vmatprep.mubr.msk.bf16.mxu0 %vm934_vm1, %v4044_v6  ;;  %3910 = vmatprep.mubr.msk.bf16.mxu1 %vm934_vm1, %v4074_v11  ;;  %v4108_v6 = vld [vmem:[%s5068_s0 + $0x3b0] sm:$0xff]  }
  0x96   :  { %3779 = vmatmul.mubr.msk.bf16.gmra.mxu0 %vm934_vm1, %v4045_v8  ;;  %3911 = vmatmul.mubr.msk.bf16.gmra.mxu1 %vm934_vm1, %v4075_v13 }
  0x97   :  { %3782 = vmatprep.mubr.msk.bf16.mxu0 %vm934_vm1, %v4048_v10  ;;  %3914 = vmatprep.mubr.msk.bf16.mxu1 %vm934_vm1, %v4078_v15 }
  0x9e   :  { %3783 = vmatmul.mubr.msk.bf16.gmra.mxu0 %vm934_vm1, %v4049_v12  ;;  %3915 = vmatmul.mubr.msk.bf16.gmra.mxu1 %vm934_vm1, %v4079_v17 }
  0x9f   :  { %3786 = vmatprep.mubr.msk.bf16.mxu0 %vm934_vm1, %v4052_v14  ;;  %3918 = vmatprep.mubr.msk.bf16.mxu1 %vm934_vm1, %v4082_v19 }
  0xa6   :  { %3787 = vmatmul.mubr.msk.bf16.gmra.mxu0 %vm934_vm1, %v4053_v16  ;;  %3919 = vmatmul.mubr.msk.bf16.gmra.mxu1 %vm934_vm1, %v4083_v21 }
  0xa7   :  { %3790 = vmatprep.mubr.msk.bf16.mxu0 %vm934_vm1, %v4056_v18  ;;  %3922 = vmatprep.mubr.msk.bf16.mxu1 %vm934_vm1, %v4086_v23 }
  0xae   :  { %3791 = vmatmul.mubr.msk.bf16.gmra.mxu0 %vm934_vm1, %v4057_v20  ;;  %3923 = vmatmul.mubr.msk.bf16.gmra.mxu1 %vm934_vm1, %v4087_v25  ;;  %v4085_v25 = vld [vmem:[%s5068_s0 + $0x1b8] sm:$0xff]  }
  0xaf   :  { %3794 = vmatprep.mubr.msk.bf16.mxu0 %vm934_vm1, %v4060_v22  ;;  %3926 = vmatprep.mubr.msk.bf16.mxu1 %vm934_vm1, %v4090_v27  ;;  %v4109_v27 = vld [vmem:[%s5068_s0 + $0x3b8] sm:$0xff]  }
  0xb6   :  { %3795 = vmatmul.mubr.msk.bf16.gmra.mxu0 %vm934_vm1, %v4061_v24  ;;  %3927 = vmatmul.mubr.msk.bf16.gmra.mxu1 %vm934_vm1, %v4091_v31  ;;  %v4110_v31 = vld [vmem:[%s5068_s0 + $0x3c0] sm:$0xff]  }
  0xb7   :  { %3798 = vmatprep.mubr.msk.bf16.mxu0 %vm934_vm1, %v4064_v26  ;;  %3930 = vmatprep.mubr.msk.bf16.mxu1 %vm934_vm1, %v4094_v33 }
  0xbe   :  { %3799 = vmatmul.mubr.msk.bf16.gmra.mxu0 %vm934_vm1, %v4065_v30  ;;  %3931 = vmatmul.mubr.msk.bf16.gmra.mxu1 %vm934_vm1, %v4095_v35  ;;  %v4088_v30 = vld [vmem:[%s5068_s0 + $0x1c0] sm:$0xff]  }
  0xbf   :  { %3802 = vmatprep.mubr.msk.bf16.mxu0 %vm934_vm1, %v4068_v32  ;;  %3934 = vmatprep.mubr.msk.bf16.mxu1 %vm934_vm1, %v4098_v37 }
  0xc6   :  { %3803 = vmatmul.mubr.msk.bf16.gmra.mxu0 %vm934_vm1, %v4069_v34  ;;  %3935 = vmatmul.mubr.msk.bf16.gmra.mxu1 %vm934_vm1, %v4099_v39 }
  0xc7   :  { %3806 = vmatprep.mubr.msk.bf16.mxu0 %vm934_vm1, %v4072_v36  ;;  %3938 = vmatprep.mubr.msk.bf16.mxu1 %vm934_vm1, %v4102_v41 }
  0xce   :  { %v3712_v42 = vpop.f32.mrf.mxu0  ;;  %3807 = vmatmul.mubr.msk.bf16.gmra.mxu0 %vm934_vm1, %v4073_v38  ;;  %v4572_v54 = vpop.f32.mrf.mxu1  ;;  %3939 = vmatmul.mubr.msk.bf16.gmra.mxu1 %vm934_vm1, %v4103_v46 }
  0xcf   :  { %3810 = vmatprep.mubr.msk.bf16.mxu0 %vm934_vm1, %v4076_v40  ;;  %v2382_v51 = vmax.f32 %v3712_v42, 0.0  ;;  %3942 = vmatprep.mubr.msk.bf16.mxu1 %vm934_vm1, %v4106_v49 }
  0xd0   :  { %v1357_v43 = vpop.f32.mrf.mxu0  ;;  %v4579_v60 = vpop.f32.mrf.mxu1 }
  0xd1   :  { %v2380_v47 = vmax.f32 %v1357_v43, 0.0  ;;  %v2640_v61 = vsel %vm2636_vm2, %v2382_v51, 0.0 }
  0xd2   :  { %v3713_v44 = vpop.f32.mrf.mxu0  ;;  %v4585_v2 = vpop.f32.mrf.mxu1 }
  0xd3   :  { %v2637_v55 = vsel %vm2636_vm2, %v2380_v47, 0.0  ;;  %v2383_v56 = vmax.f32 %v3713_v44, 0.0 }
  0xd4   :  { %v1360_v50 = vpop.f32.mrf.mxu0  ;;  %v4597_v9 = vpop.f32.mrf.mxu1 }
  0xd5   :  { %v2381_v52 = vmax.f32 %v1360_v50, 0.0  ;;  %v2642_v4 = vsel %vm2636_vm2, %v2383_v56, 0.0  ;;  %v4089_v50 = vld [vmem:[%s5068_s0 + $0x1c8] sm:$0xff]   ;;  %v4112_v56 = vld [vmem:[%s5068_s0 + $0x3d0] sm:$0xff]  }
  0xd6   :  { %v3716_v53 = vpop.f32.mrf.mxu0  ;;  %3811 = vmatmul.mubr.msk.bf16.gmra.mxu0 %vm934_vm1, %v4077_v45  ;;  %v4601_v15 = vpop.f32.mrf.mxu1  ;;  %3943 = vmatmul.mubr.msk.bf16.gmra.mxu1 %vm934_vm1, %v4107_v3 }
  0xd7   :  { %v2638_v57 = vsel %vm2636_vm2, %v2381_v52, 0.0  ;;  %3814 = vmatprep.mubr.msk.bf16.mxu0 %vm934_vm1, %v4080_v48  ;;  %v2386_v10 = vmax.f32 %v3716_v53, 0.0  ;;  %3946 = vmatprep.mubr.msk.bf16.mxu1 %vm934_vm1, %v4108_v6  ;;  %v4111_v52 = vld [vmem:[%s5068_s0 + $0x3c8] sm:$0xff]  }
  0xd8   :  { %v2639_v58 = vadd.f32 %v2638_v57, %v2637_v55  ;;  %v1373_v59 = vpop.f32.mrf.mxu0  ;;  %v4607_v20 = vpop.f32.mrf.mxu1  ;;  %v4092_v55 = vld [vmem:[%s5068_s0 + $0x1d0] sm:$0xff]  }
  0xd9   :  { %v2384_v62 = vmax.f32 %v1373_v59, 0.0  ;;  %v2648_v21 = vsel %vm2636_vm2, %v2386_v10, 0.0 }
  0xda   :  { %v2641_v63 = vadd.f32 %v2640_v61, %v2639_v58  ;;  %v3717_v0 = vpop.f32.mrf.mxu0  ;;  %v4613_v26 = vpop.f32.mrf.mxu1 }
  0xdb   :  { %v2644_v11 = vsel %vm2636_vm2, %v2384_v62, 0.0  ;;  %v2387_v16 = vmax.f32 %v3717_v0, 0.0 }
  0xdc   :  { %v2643_v7 = vadd.f32 %v2642_v4, %v2641_v63  ;;  %v1376_v8 = vpop.f32.mrf.mxu0  ;;  %v4625_v34 = vpop.f32.mrf.mxu1 }
  0xdd   :  { %v2385_v12 = vmax.f32 %v1376_v8, 0.0  ;;  %v2650_v29 = vsel %vm2636_vm2, %v2387_v16, 0.0 }
  0xde   :  { %v2645_v13 = vadd.f32 %v2644_v11, %v2643_v7  ;;  %v3720_v14 = vpop.f32.mrf.mxu0  ;;  %3815 = vmatmul.mubr.msk.bf16.gmra.mxu0 %vm934_vm1, %v4081_v1  ;;  %v4629_v40 = vpop.f32.mrf.mxu1  ;;  %3947 = vmatmul.mubr.msk.bf16.gmra.mxu1 %vm934_vm1, %v4109_v27 }
  0xdf   :  { %v2646_v17 = vsel %vm2636_vm2, %v2385_v12, 0.0  ;;  %3818 = vmatprep.mubr.msk.bf16.mxu0 %vm934_vm1, %v4084_v5  ;;  %v2390_v35 = vmax.f32 %v3720_v14, 0.0  ;;  %3950 = vmatprep.mubr.msk.bf16.mxu1 %vm934_vm1, %v4110_v31  ;;  %v4093_v14 = vld [vmem:[%s5068_s0 + $0x1d8] sm:$0xff]  }
  0xe0   :  { %v2647_v18 = vadd.f32 %v2646_v17, %v2645_v13  ;;  %v1389_v19 = vpop.f32.mrf.mxu0  ;;  %v4635_v45 = vpop.f32.mrf.mxu1  ;;  %v4113_v17 = vld [vmem:[%s5068_s0 + $0x3d8] sm:$0xff]  }
  0xe1   :  { %v2388_v22 = vmax.f32 %v1389_v19, 0.0  ;;  %v2656_v46 = vsel %vm2636_vm2, %v2390_v35, 0.0 }
  0xe2   :  { %v2649_v23 = vadd.f32 %v2648_v21, %v2647_v18  ;;  %v3721_v24 = vpop.f32.mrf.mxu0  ;;  %v4641_v51 = vpop.f32.mrf.mxu1  ;;  %v3199_v18 = vld [vmem:[%s5069_s2 + $0x10] sm:$0xff]  ;;  %v4096_v21 = vld [vmem:[%s5068_s0 + $0x1e0] sm:$0xff]  }
  0xe3   :  { %v2652_v36 = vsel %vm2636_vm2, %v2388_v22, 0.0  ;;  %v2391_v41 = vmax.f32 %v3721_v24, 0.0  ;;  %v4114_v22 = vld [vmem:[%s5068_s0 + $0x3e0] sm:$0xff]   ;;  %3969 = vmatpush3.msra.mxu1 %v3199_v18  ;;  %v4117_v18 = vld [vmem:[%s5068_s0 + $0x3f8] sm:$0xff]  }
  0xe4   :  { %v2651_v32 = vadd.f32 %v2650_v29, %v2649_v23  ;;  %v1392_v33 = vpop.f32.mrf.mxu0  ;;  %v4653_v59 = vpop.f32.mrf.mxu1  ;;  %3970 = vmatprep.subr.mxu1 %v4118_v28 }
  0xe5   :  { %v2389_v37 = vmax.f32 %v1392_v33, 0.0  ;;  %v2658_v53 = vsel %vm2636_vm2, %v2391_v41, 0.0 }
  0xe6   :  { %v2653_v38 = vadd.f32 %v2652_v36, %v2651_v32  ;;  %v3724_v39 = vpop.f32.mrf.mxu0  ;;  %3819 = vmatmul.mubr.msk.bf16.gmra.mxu0 %vm934_vm1, %v4085_v25  ;;  %v4657_v3 = vpop.f32.mrf.mxu1  ;;  %3951 = vmatmul.mubr.msk.bf16.gmra.mxu1 %vm934_vm1, %v4111_v52  ;;  %v4116_v52 = vld [vmem:[%s5068_s0 + $0x3f0] sm:$0xff]  }
  0xe7   :  { %v2654_v42 = vsel %vm2636_vm2, %v2389_v37, 0.0  ;;  %3822 = vmatprep.mubr.msk.bf16.mxu0 %vm934_vm1, %v4088_v30  ;;  %v2394_v61 = vmax.f32 %v3724_v39, 0.0  ;;  %3954 = vmatprep.mubr.msk.bf16.mxu1 %vm934_vm1, %v4112_v56 }
  0xe8   :  { %v2655_v43 = vadd.f32 %v2654_v42, %v2653_v38  ;;  %v1405_v44 = vpop.f32.mrf.mxu0  ;;  %v4663_v8 = vpop.f32.mrf.mxu1 }
  0xe9   :  { %v2392_v47 = vmax.f32 %v1405_v44, 0.0  ;;  %v2664_v10 = vsel %vm2636_vm2, %v2394_v61, 0.0 }
  0xea   :  { %v2657_v48 = vadd.f32 %v2656_v46, %v2655_v43  ;;  %v3725_v49 = vpop.f32.mrf.mxu0  ;;  %v4669_v16 = vpop.f32.mrf.mxu1  ;;  %v4097_v46 = vld [vmem:[%s5068_s0 + $0x1e8] sm:$0xff]  }
  0xeb   :  { %v2660_v62 = vsel %vm2636_vm2, %v2392_v47, 0.0  ;;  %v2395_v4 = vmax.f32 %v3725_v49, 0.0 }
  0xec   :  { %v2659_v57 = vadd.f32 %v2658_v53, %v2657_v48  ;;  %v1408_v58 = vpop.f32.mrf.mxu0  ;;  %v4684_v25 = vpop.f32.mrf.mxu1  ;;  %v4115_v48 = vld [vmem:[%s5068_s0 + $0x3e8] sm:$0xff]  }
  0xed   :  { %v2393_v63 = vmax.f32 %v1408_v58, 0.0  ;;  %v2666_v19 = vsel %vm2636_vm2, %v2395_v4, 0.0 }
  0xee   :  { %v2661_v0 = vadd.f32 %v2660_v62, %v2659_v57  ;;  %v3728_v1 = vpop.f32.mrf.mxu0  ;;  %3823 = vmatmul.mubr.msk.bf16.gmra.mxu0 %vm934_vm1, %v4089_v50  ;;  %v4689_v33 = vpop.f32.mrf.mxu1  ;;  %3955 = vmatmul.mubr.msk.bf16.gmra.mxu1 %vm934_vm1, %v4113_v17  ;;  %v4100_v50 = vld [vmem:[%s5068_s0 + $0x1f0] sm:$0xff]  }
  0xef   :  { %v2662_v5 = vsel %vm2636_vm2, %v2393_v63, 0.0  ;;  %3826 = vmatprep.mubr.msk.bf16.mxu0 %vm934_vm1, %v4092_v55  ;;  %v2398_v27 = vmax.f32 %v3728_v1, 0.0  ;;  %3958 = vmatprep.mubr.msk.bf16.mxu1 %vm934_vm1, %v4114_v22 }
  0xf0   :  { %v2663_v6 = vadd.f32 %v2662_v5, %v2661_v0  ;;  %v1421_v7 = vpop.f32.mrf.mxu0  ;;  %v4695_v39 = vpop.f32.mrf.mxu1 }
  0xf1   :  { %v2396_v11 = vmax.f32 %v1421_v7, 0.0  ;;  %v2672_v41 = vsel %vm2636_vm2, %v2398_v27, 0.0 }
  0xf2   :  { %v2665_v12 = vadd.f32 %v2664_v10, %v2663_v6  ;;  %v3729_v13 = vpop.f32.mrf.mxu0  ;;  %v4701_v47 = vpop.f32.mrf.mxu1 }
  0xf3   :  { %v2668_v29 = vsel %vm2636_vm2, %v2396_v11, 0.0  ;;  %v2399_v35 = vmax.f32 %v3729_v13, 0.0 }
  0xf4   :  { %v2667_v23 = vadd.f32 %v2666_v19, %v2665_v12  ;;  %v1424_v24 = vpop.f32.mrf.mxu0  ;;  %v4713_v56 = vpop.f32.mrf.mxu1 }
  0xf5   :  { %v2397_v30 = vmax.f32 %v1424_v24, 0.0  ;;  %v2674_v49 = vsel %vm2636_vm2, %v2399_v35, 0.0 }
  0xf6   :  { %v2669_v31 = vadd.f32 %v2668_v29, %v2667_v23  ;;  %v3732_v32 = vpop.f32.mrf.mxu0  ;;  %3827 = vmatmul.mubr.msk.bf16.gmra.mxu0 %vm934_vm1, %v4093_v14  ;;  %v4717_v0 = vpop.f32.mrf.mxu1  ;;  %3959 = vmatmul.mubr.msk.bf16.gmra.mxu1 %vm934_vm1, %v4115_v48  ;;  %v4101_v14 = vld [vmem:[%s5068_s0 + $0x1f8] sm:$0xff]  }
  0xf7   :  { %v2670_v36 = vsel %vm2636_vm2, %v2397_v30, 0.0  ;;  %3830 = vmatprep.mubr.msk.bf16.mxu0 %vm934_vm1, %v4096_v21  ;;  %v2402_v57 = vmax.f32 %v3732_v32, 0.0  ;;  %3962 = vmatprep.mubr.msk.bf16.mxu1 %vm934_vm1, %v4116_v52  ;;  %v4104_v21 = vld [vmem:[%s5068_s0 + $0x200] sm:$0xff]  }
  0xf8   :  { %v2671_v37 = vadd.f32 %v2670_v36, %v2669_v31  ;;  %v1437_v38 = vpop.f32.mrf.mxu0  ;;  %v4723_v7 = vpop.f32.mrf.mxu1 }
  0xf9   :  { %v2400_v42 = vmax.f32 %v1437_v38, 0.0  ;;  %v2680_v10 = vsel %vm2636_vm2, %v2402_v57, 0.0 }
  0xfa   :  { %v2673_v43 = vadd.f32 %v2672_v41, %v2671_v37  ;;  %v3733_v44 = vpop.f32.mrf.mxu0  ;;  %v4729_v17 = vpop.f32.mrf.mxu1 }
  0xfb   :  { %v2676_v58 = vsel %vm2636_vm2, %v2400_v42, 0.0  ;;  %v2403_v1 = vmax.f32 %v3733_v44, 0.0 }
  0xfc   :  { %v2675_v53 = vadd.f32 %v2674_v49, %v2673_v43  ;;  %v1440_v55 = vpop.f32.mrf.mxu0  ;;  %v4738_v24 = vpop.f32.mrf.mxu1  ;;  %v4105_v49 = vld [vmem:[%s5068_s0 + $0x208] sm:$0xff]  }
  0xfd   :  { %v2401_v61 = vmax.f32 %v1440_v55, 0.0  ;;  %v2682_v19 = vsel %vm2636_vm2, %v2403_v1, 0.0 }
  0xfe   :  { %v2677_v62 = vadd.f32 %v2676_v58, %v2675_v53  ;;  %v3736_v63 = vpop.f32.mrf.mxu0  ;;  %3831 = vmatmul.mubr.msk.bf16.gmra.mxu0 %vm934_vm1, %v4097_v46  ;;  %v4742_v35 = vpop.f32.mrf.mxu1  ;;  %3963 = vmatmul.mubr.msk.bf16.gmra.mxu1 %vm934_vm1, %v4117_v18 }
  0xff   :  { %v2678_v4 = vsel %vm2636_vm2, %v2401_v61, 0.0  ;;  %3834 = vmatprep.mubr.msk.bf16.mxu0 %vm934_vm1, %v4100_v50  ;;  %v2406_v27 = vmax.f32 %v3736_v63, 0.0  ;;  %3974 = vmatprep.mubr.msk.f32.mxu1 %vm4119_vm4, %v4118_v28 }
 0x100   :  { %v2679_v5 = vadd.f32 %v2678_v4, %v2677_v62  ;;  %v1453_v6 = vpop.f32.mrf.mxu0  ;;  %v4747_v42 = vpop.f32.mrf.mxu1 }
 0x101   :  { %v2404_v11 = vmax.f32 %v1453_v6, 0.0  ;;  %v2688_v43 = vsel %vm2636_vm2, %v2406_v27, 0.0 }
 0x102   :  { %v2681_v12 = vadd.f32 %v2680_v10, %v2679_v5  ;;  %v3737_v13 = vpop.f32.mrf.mxu0  ;;  %v4753_v50 = vpop.f32.mrf.mxu1 }
 0x103   :  { %v2684_v29 = vsel %vm2636_vm2, %v2404_v11, 0.0  ;;  %v2407_v36 = vmax.f32 %v3737_v13, 0.0 }
 0x104   :  { %v2683_v22 = vadd.f32 %v2682_v19, %v2681_v12  ;;  %v1456_v23 = vpop.f32.mrf.mxu0  ;;  %v4756_v57 = vpop.f32.mrf.mxu1 }
 0x105   :  { %v2405_v30 = vmax.f32 %v1456_v23, 0.0  ;;  %v2690_v52 = vsel %vm2636_vm2, %v2407_v36, 0.0 }
 0x106   :  { %v2685_v31 = vadd.f32 %v2684_v29, %v2683_v22  ;;  %v3740_v32 = vpop.f32.mrf.mxu0  ;;  %3835 = vmatmul.mubr.msk.bf16.gmra.mxu0 %vm934_vm1, %v4101_v14  ;;  %v3872_v4 = vpop.f32.mrf.mxu1 }
 0x107   :  { %v2686_v37 = vsel %vm2636_vm2, %v2405_v30, 0.0  ;;  %3838 = vmatprep.mubr.msk.bf16.mxu0 %vm934_vm1, %v4104_v21  ;;  %v2410_v58 = vmax.f32 %v3740_v32, 0.0  ;;  %v2542_v21 = vmax.f32 %v3872_v4, 0.0 }
 0x108   :  { %v2687_v38 = vadd.f32 %v2686_v37, %v2685_v31  ;;  %v1469_v41 = vpop.f32.mrf.mxu0  ;;  %v1997_v12 = vpop.f32.mrf.mxu1 }
 0x109   :  { %v2408_v44 = vmax.f32 %v1469_v41, 0.0  ;;  %v2696_v13 = vsel %vm2636_vm2, %v2410_v58, 0.0  ;;  %v2540_v14 = vmax.f32 %v1997_v12, 0.0 }
 0x10a   :  { %v2689_v46 = vadd.f32 %v2688_v43, %v2687_v38  ;;  %v3741_v48 = vpop.f32.mrf.mxu0  ;;  %v3873_v22 = vpop.f32.mrf.mxu1 }
 0x10b   :  { %v2692_v61 = vsel %vm2636_vm2, %v2408_v44, 0.0  ;;  %v2411_v5 = vmax.f32 %v3741_v48, 0.0  ;;  %v2982_v37 = vsel %vm2636_vm2, %v2540_v14, 0.0  ;;  %v2543_v38 = vmax.f32 %v3873_v22, 0.0 }
 0x10c   :  { %v2691_v53 = vadd.f32 %v2690_v52, %v2689_v46  ;;  %v1472_v55 = vpop.f32.mrf.mxu0  ;;  %v2000_v32 = vpop.f32.mrf.mxu1  ;;  %v2985_v44 = vsel %vm2636_vm2, %v2542_v21, 0.0 }
 0x10d   :  { %v2409_v62 = vmax.f32 %v1472_v55, 0.0  ;;  %v2698_v23 = vsel %vm2636_vm2, %v2411_v5, 0.0  ;;  %v2541_v41 = vmax.f32 %v2000_v32, 0.0  ;;  %v2987_v4 = vsel %vm2636_vm2, %v2543_v38, 0.0 }
 0x10e   :  { %v2693_v63 = vadd.f32 %v2692_v61, %v2691_v53  ;;  %v3744_v1 = vpop.f32.mrf.mxu0  ;;  %3839 = vmatmul.mubr.msk.bf16.gmra.mxu0 %vm934_vm1, %v4105_v49  ;;  %v3876_v46 = vpop.f32.mrf.mxu1 }
 0x10f   :  { %v2694_v6 = vsel %vm2636_vm2, %v2409_v62, 0.0  ;;  %v2414_v30 = vmax.f32 %v3744_v1, 0.0  ;;  %v2983_v53 = vsel %vm2636_vm2, %v2541_v41, 0.0  ;;  %v2546_v14 = vmax.f32 %v3876_v46, 0.0 }
 0x110   :  { %v2695_v10 = vadd.f32 %v2694_v6, %v2693_v63  ;;  %v1485_v11 = vpop.f32.mrf.mxu0  ;;  %v2984_v61 = vadd.f32 %v2983_v53, %v2982_v37  ;;  %v2013_v62 = vpop.f32.mrf.mxu1 }
 0x111   :  { %v2412_v27 = vmax.f32 %v1485_v11, 0.0  ;;  %v2709_v63 = vsel %vm2636_vm2, %v2414_v30, 0.0  ;;  %v2544_v5 = vmax.f32 %v2013_v62, 0.0  ;;  %v2993_v46 = vsel %vm2636_vm2, %v2546_v14, 0.0 }
 0x112   :  { %v2697_v18 = vadd.f32 %v2696_v13, %v2695_v10  ;;  %v3745_v19 = vpop.f32.mrf.mxu0  ;;  %v2986_v11 = vadd.f32 %v2985_v44, %v2984_v61  ;;  %v3877_v12 = vpop.f32.mrf.mxu1 }
 0x113   :  { %v2706_v48 = vsel %vm2636_vm2, %v2412_v27, 0.0  ;;  %v2415_v49 = vmax.f32 %v3745_v19, 0.0  ;;  %v2547_v32 = vmax.f32 %v3877_v12, 0.0 }
 0x114   :  { %v4763_v29 = vadd.f32 %v2698_v23, %v2697_v18  ;;  %v1488_v31 = vpop.f32.mrf.mxu0  ;;  %v2989_v18 = vsel %vm2636_vm2, %v2544_v5, 0.0  ;;  %v2988_v23 = vadd.f32 %v2987_v4, %v2986_v11  ;;  %v2016_v27 = vpop.f32.mrf.mxu1 }
 0x115   :  { %v2413_v36 = vmax.f32 %v1488_v31, 0.0  ;;  %v2711_v13 = vsel %vm2636_vm2, %v2415_v49, 0.0 }
 0x116   :  { %v3748_v43 = vpop.f32.mrf.mxu0  ;;  %v2990_v41 = vadd.f32 %v2989_v18, %v2988_v23  ;;  %v3880_v44 = vpop.f32.mrf.mxu1 }
 0x117   :  { %v2707_v52 = vsel %vm2636_vm2, %v2413_v36, 0.0  ;;  %v2418_v19 = vmax.f32 %v3748_v43, 0.0  ;;  %v2545_v36 = vmax.f32 %v2016_v27, 0.0  ;;  %v2550_v12 = vmax.f32 %v3880_v44, 0.0 }
 0x118   :  { %v2708_v55 = vadd.f32 %v2707_v52, %v2706_v48  ;;  %v1501_v58 = vpop.f32.mrf.mxu0 }
 0x119   :  { %v2416_v1 = vmax.f32 %v1501_v58, 0.0  ;;  %v2991_v43 = vsel %vm2636_vm2, %v2545_v36, 0.0  ;;  %v2029_v58 = vpop.f32.mrf.mxu1  ;;  %v2717_v61 = vsel %vm2636_vm2, %v2418_v19, 0.0  ;;  %v3001_v44 = vsel %vm2636_vm2, %v2550_v12, 0.0 }
 0x11a   :  { %v2710_v6 = vadd.f32 %v2709_v63, %v2708_v55  ;;  %v3749_v10 = vpop.f32.mrf.mxu0  ;;  %v2992_v55 = vadd.f32 %v2991_v43, %v2990_v41  ;;  %v2995_v63 = vsel %vm2636_vm2, %v2547_v32, 0.0 }
 0x11b   :  { %v2713_v30 = vsel %vm2636_vm2, %v2416_v1, 0.0  ;;  %v2419_v48 = vmax.f32 %v3749_v10, 0.0  ;;  %v2548_v1 = vmax.f32 %v2029_v58, 0.0  ;;  %v3881_v10 = vpop.f32.mrf.mxu1 }
 0x11c   :  { %v2712_v21 = vadd.f32 %v2711_v13, %v2710_v6  ;;  %v1504_v22 = vpop.f32.mrf.mxu0  ;;  %v2994_v6 = vadd.f32 %v2993_v46, %v2992_v55 }
 0x11d   :  { %v2417_v31 = vmax.f32 %v1504_v22, 0.0  ;;  %v2719_v11 = vsel %vm2636_vm2, %v2419_v48, 0.0  ;;  %v2997_v13 = vsel %vm2636_vm2, %v2548_v1, 0.0  ;;  %v2032_v23 = vpop.f32.mrf.mxu1 }
 0x11e   :  { %v2714_v37 = vadd.f32 %v2713_v30, %v2712_v21  ;;  %v3752_v38 = vpop.f32.mrf.mxu0  ;;  %v2996_v22 = vadd.f32 %v2995_v63, %v2994_v6  ;;  %v2551_v30 = vmax.f32 %v3881_v10, 0.0 }
 0x11f   :  { %v2715_v49 = vsel %vm2636_vm2, %v2417_v31, 0.0  ;;  %v2422_v14 = vmax.f32 %v3752_v38, 0.0  ;;  %v2549_v31 = vmax.f32 %v2032_v23, 0.0  ;;  %v3884_v41 = vpop.f32.mrf.mxu1 }
 0x120   :  { %v2716_v52 = vadd.f32 %v2715_v49, %v2714_v37  ;;  %v1517_v53 = vpop.f32.mrf.mxu0  ;;  %v2998_v37 = vadd.f32 %v2997_v13, %v2996_v22  ;;  %v2554_v10 = vmax.f32 %v3884_v41, 0.0 }
 0x121   :  { %v2420_v62 = vmax.f32 %v1517_v53, 0.0  ;;  %v2999_v38 = vsel %vm2636_vm2, %v2549_v31, 0.0  ;;  %v2045_v53 = vpop.f32.mrf.mxu1  ;;  %v2725_v55 = vsel %vm2636_vm2, %v2422_v14, 0.0 }
 0x122   :  { %v2718_v4 = vadd.f32 %v2717_v61, %v2716_v52  ;;  %v3753_v5 = vpop.f32.mrf.mxu0  ;;  %v3000_v52 = vadd.f32 %v2999_v38, %v2998_v37  ;;  %v3003_v61 = vsel %vm2636_vm2, %v2551_v30, 0.0  ;;  %v3009_v41 = vsel %vm2636_vm2, %v2554_v10, 0.0 }
 0x123   :  { %v2721_v19 = vsel %vm2636_vm2, %v2420_v62, 0.0  ;;  %v2423_v49 = vmax.f32 %v3753_v5, 0.0  ;;  %v2552_v62 = vmax.f32 %v2045_v53, 0.0  ;;  %v3885_v5 = vpop.f32.mrf.mxu1 }
 0x124   :  { %v2720_v18 = vadd.f32 %v2719_v11, %v2718_v4  ;;  %v1520_v21 = vpop.f32.mrf.mxu0  ;;  %v3002_v4 = vadd.f32 %v3001_v44, %v3000_v52 }
 0x125   :  { %v2421_v27 = vmax.f32 %v1520_v21, 0.0  ;;  %v2727_v6 = vsel %vm2636_vm2, %v2423_v49, 0.0  ;;  %v3005_v11 = vsel %vm2636_vm2, %v2552_v62, 0.0  ;;  %v2048_v22 = vpop.f32.mrf.mxu1 }
 0x126   :  { %v2722_v32 = vadd.f32 %v2721_v19, %v2720_v18  ;;  %v3756_v36 = vpop.f32.mrf.mxu0  ;;  %v3004_v21 = vadd.f32 %v3003_v61, %v3002_v4  ;;  %v2555_v19 = vmax.f32 %v3885_v5, 0.0  ;;  %v3198_v4 = vld [vmem:[%s5069_s2 + $0x8] sm:$0xff] }
 0x127   :  { %v2723_v48 = vsel %vm2636_vm2, %v2421_v27, 0.0  ;;  %v2426_v12 = vmax.f32 %v3756_v36, 0.0  ;;  %v2553_v27 = vmax.f32 %v2048_v22, 0.0  ;;  %v3888_v37 = vpop.f32.mrf.mxu1  ;;  %3971 = vmatpush3.msra.mxu1 %v3198_v4 }
 0x128   :  { %v2724_v46 = vadd.f32 %v2723_v48, %v2722_v32  ;;  %v1533_v43 = vpop.f32.mrf.mxu0  ;;  %v3006_v32 = vadd.f32 %v3005_v11, %v3004_v21  ;;  %3972 = vmatprep.subr.mxu1 %v4118_v28 }
 0x129   :  { %v2424_v58 = vmax.f32 %v1533_v43, 0.0  ;;  %v3007_v36 = vsel %vm2636_vm2, %v2553_v27, 0.0  ;;  %v2061_v43 = vpop.f32.mrf.mxu1  ;;  %v2733_v52 = vsel %vm2636_vm2, %v2426_v12, 0.0 }
 0x12a   :  { %v2726_v63 = vadd.f32 %v2725_v55, %v2724_v46  ;;  %v3757_v1 = vpop.f32.mrf.mxu0  ;;  %v3008_v46 = vadd.f32 %v3007_v36, %v3006_v32  ;;  %v3011_v55 = vsel %vm2636_vm2, %v2555_v19, 0.0 }
 0x12b   :  { %v2729_v14 = vsel %vm2636_vm2, %v2424_v58, 0.0  ;;  %v2427_v48 = vmax.f32 %v3757_v1, 0.0  ;;  %v2556_v58 = vmax.f32 %v2061_v43, 0.0  ;;  %v3889_v1 = vpop.f32.mrf.mxu1 }
 0x12c   :  { %v2728_v13 = vadd.f32 %v2727_v6, %v2726_v63  ;;  %v1536_v18 = vpop.f32.mrf.mxu0  ;;  %v3010_v63 = vadd.f32 %v3009_v41, %v3008_v46  ;;  %v2558_v6 = vmax.f32 %v3888_v37, 0.0 }
 0x12d   :  { %v2425_v23 = vmax.f32 %v1536_v18, 0.0  ;;  %v2735_v5 = vsel %vm2636_vm2, %v2427_v48, 0.0  ;;  %v3013_v10 = vsel %vm2636_vm2, %v2556_v58, 0.0  ;;  %v2064_v21 = vpop.f32.mrf.mxu1 }
 0x12e   :  { %v2730_v30 = vadd.f32 %v2729_v14, %v2728_v13  ;;  %v3760_v31 = vpop.f32.mrf.mxu0  ;;  %v3012_v18 = vadd.f32 %v3011_v55, %v3010_v63  ;;  %v2557_v19 = vmax.f32 %v2064_v21, 0.0 }
 0x12f   :  { %v2731_v49 = vsel %vm2636_vm2, %v2425_v23, 0.0  ;;  %v2430_v11 = vmax.f32 %v3760_v31, 0.0  ;;  %v2559_v23 = vmax.f32 %v3889_v1, 0.0  ;;  %v3892_v48 = vpop.f32.mrf.mxu1  ;;  %v3017_v31 = vsel %vm2636_vm2, %v2558_v6, 0.0 }
 0x130   :  { %v2732_v44 = vadd.f32 %v2731_v49, %v2730_v30  ;;  %v1549_v38 = vpop.f32.mrf.mxu0  ;;  %v3014_v32 = vadd.f32 %v3013_v10, %v3012_v18  ;;  %v3015_v41 = vsel %vm2636_vm2, %v2557_v19, 0.0  ;;  %v2562_v4 = vmax.f32 %v3892_v48, 0.0 }
 0x131   :  { %v2428_v53 = vmax.f32 %v1549_v38, 0.0  ;;  %v2077_v46 = vpop.f32.mrf.mxu1  ;;  %v2741_v43 = vsel %vm2636_vm2, %v2430_v11, 0.0 }
 0x132   :  { %v2734_v61 = vadd.f32 %v2733_v52, %v2732_v44  ;;  %v3761_v62 = vpop.f32.mrf.mxu0  ;;  %v3016_v38 = vadd.f32 %v3015_v41, %v3014_v32  ;;  %v2560_v55 = vmax.f32 %v2077_v46, 0.0  ;;  %v3025_v48 = vsel %vm2636_vm2, %v2562_v4, 0.0 }
 0x133   :  { %v2737_v22 = vsel %vm2636_vm2, %v2428_v53, 0.0  ;;  %v2431_v37 = vmax.f32 %v3761_v62, 0.0  ;;  %v3019_v53 = vsel %vm2636_vm2, %v2559_v23, 0.0  ;;  %v3893_v62 = vpop.f32.mrf.mxu1 }
 0x134   :  { %v2736_v12 = vadd.f32 %v2735_v5, %v2734_v61  ;;  %v1552_v13 = vpop.f32.mrf.mxu0  ;;  %v3018_v63 = vadd.f32 %v3017_v31, %v3016_v38  ;;  %v3021_v5 = vsel %vm2636_vm2, %v2560_v55, 0.0 }
 0x135   :  { %v2429_v14 = vmax.f32 %v1552_v13, 0.0  ;;  %v2743_v1 = vsel %vm2636_vm2, %v2431_v37, 0.0  ;;  %v2080_v18 = vpop.f32.mrf.mxu1 }
 0x136   :  { %v2738_v27 = vadd.f32 %v2737_v22, %v2736_v12  ;;  %v3764_v30 = vpop.f32.mrf.mxu0  ;;  %v3020_v13 = vadd.f32 %v3019_v53, %v3018_v63  ;;  %v2563_v22 = vmax.f32 %v3893_v62, 0.0 }
 0x137   :  { %v2739_v49 = vsel %vm2636_vm2, %v2429_v14, 0.0  ;;  %v2434_v6 = vmax.f32 %v3764_v30, 0.0  ;;  %v2561_v14 = vmax.f32 %v2080_v18, 0.0  ;;  %v3896_v32 = vpop.f32.mrf.mxu1 }
 0x138   :  { %v2740_v36 = vadd.f32 %v2739_v49, %v2738_v27  ;;  %v1565_v44 = vpop.f32.mrf.mxu0  ;;  %v3022_v27 = vadd.f32 %v3021_v5, %v3020_v13  ;;  %v2566_v62 = vmax.f32 %v3896_v32, 0.0 }
 0x139   :  { %v2432_v52 = vmax.f32 %v1565_v44, 0.0  ;;  %v3023_v30 = vsel %vm2636_vm2, %v2561_v14, 0.0  ;;  %v2093_v44 = vpop.f32.mrf.mxu1  ;;  %v2749_v38 = vsel %vm2636_vm2, %v2434_v6, 0.0 }
 0x13a   :  { %v2742_v58 = vadd.f32 %v2741_v43, %v2740_v36  ;;  %v3765_v61 = vpop.f32.mrf.mxu0  ;;  %v3024_v36 = vadd.f32 %v3023_v30, %v3022_v27  ;;  %v3027_v43 = vsel %vm2636_vm2, %v2563_v22, 0.0  ;;  %v3033_v32 = vsel %vm2636_vm2, %v2566_v62, 0.0 }
 0x13b   :  { %v2745_v11 = vsel %vm2636_vm2, %v2432_v52, 0.0  ;;  %v2435_v49 = vmax.f32 %v3765_v61, 0.0  ;;  %v2564_v52 = vmax.f32 %v2093_v44, 0.0  ;;  %v3897_v61 = vpop.f32.mrf.mxu1 }
 0x13c   :  { %v2744_v10 = vadd.f32 %v2743_v1, %v2742_v58  ;;  %v1568_v12 = vpop.f32.mrf.mxu0  ;;  %v3026_v58 = vadd.f32 %v3025_v48, %v3024_v36 }
 0x13d   :  { %v2433_v21 = vmax.f32 %v1568_v12, 0.0  ;;  %v2751_v63 = vsel %vm2636_vm2, %v2435_v49, 0.0  ;;  %v3029_v1 = vsel %vm2636_vm2, %v2564_v52, 0.0  ;;  %v2096_v13 = vpop.f32.mrf.mxu1 }
 0x13e   :  { %v2746_v23 = vadd.f32 %v2745_v11, %v2744_v10  ;;  %v3768_v19 = vpop.f32.mrf.mxu0  ;;  %v3028_v12 = vadd.f32 %v3027_v43, %v3026_v58  ;;  %v2567_v11 = vmax.f32 %v3897_v61, 0.0  ;;  %v2700_v43 = vrot.slane %v4763_v29, 4 }
 0x13f   :  { %v2747_v37 = vsel %vm2636_vm2, %v2433_v21, 0.0  ;;  %v2438_v4 = vmax.f32 %v3768_v19, 0.0  ;;  %v2565_v21 = vmax.f32 %v2096_v13, 0.0  ;;  %v3900_v27 = vpop.f32.mrf.mxu1 }
 0x140   :  { %v2748_v31 = vadd.f32 %v2747_v37, %v2746_v23  ;;  %v1581_v41 = vpop.f32.mrf.mxu0  ;;  %v3030_v23 = vadd.f32 %v3029_v1, %v3028_v12 }
 0x141   :  { %v2436_v46 = vmax.f32 %v1581_v41, 0.0  ;;  %v3031_v19 = vsel %vm2636_vm2, %v2565_v21, 0.0  ;;  %v2109_v41 = vpop.f32.mrf.mxu1  ;;  %v2757_v36 = vsel %vm2636_vm2, %v2438_v4, 0.0  ;;  %v2701_v21 = vadd.f32 %v2700_v43, %v4763_v29 }
 0x142   :  { %v2750_v53 = vadd.f32 %v2749_v38, %v2748_v31  ;;  %v3769_v55 = vpop.f32.mrf.mxu0  ;;  %v3032_v31 = vadd.f32 %v3031_v19, %v3030_v23  ;;  %v3035_v38 = vsel %vm2636_vm2, %v2567_v11, 0.0 }
 0x143   :  { %v2753_v6 = vsel %vm2636_vm2, %v2436_v46, 0.0  ;;  %v2439_v37 = vmax.f32 %v3769_v55, 0.0  ;;  %v2568_v46 = vmax.f32 %v2109_v41, 0.0  ;;  %v3901_v58 = vpop.f32.mrf.mxu1 }
 0x144   :  { %v2752_v5 = vadd.f32 %v2751_v63, %v2750_v53  ;;  %v1584_v10 = vpop.f32.mrf.mxu0  ;;  %v3034_v55 = vadd.f32 %v3033_v32, %v3032_v31  ;;  %v2570_v63 = vmax.f32 %v3900_v27, 0.0 }
 0x145   :  { %v2437_v18 = vmax.f32 %v1584_v10, 0.0  ;;  %v2759_v61 = vsel %vm2636_vm2, %v2439_v37, 0.0  ;;  %v3037_v62 = vsel %vm2636_vm2, %v2568_v46, 0.0  ;;  %v2112_v4 = vpop.f32.mrf.mxu1 }
 0x146   :  { %v2754_v22 = vadd.f32 %v2753_v6, %v2752_v5  ;;  %v3772_v14 = vpop.f32.mrf.mxu0  ;;  %v3036_v12 = vadd.f32 %v3035_v38, %v3034_v55  ;;  %v2569_v11 = vmax.f32 %v2112_v4, 0.0  ;;  %v2702_v38 = vrot.slane %v2701_v21, 2 }
 0x147   :  { %v2755_v49 = vsel %vm2636_vm2, %v2437_v18, 0.0  ;;  %v2442_v1 = vmax.f32 %v3772_v14, 0.0  ;;  %v2571_v18 = vmax.f32 %v3901_v58, 0.0  ;;  %v3904_v32 = vpop.f32.mrf.mxu1  ;;  %v3041_v14 = vsel %vm2636_vm2, %v2570_v63, 0.0 }
 0x148   :  { %v2756_v48 = vadd.f32 %v2755_v49, %v2754_v22  ;;  %v1597_v30 = vpop.f32.mrf.mxu0  ;;  %v3038_v49 = vadd.f32 %v3037_v62, %v3036_v12  ;;  %v3039_v19 = vsel %vm2636_vm2, %v2569_v11, 0.0 }
 0x149   :  { %v2440_v44 = vmax.f32 %v1597_v30, 0.0  ;;  %v2125_v41 = vpop.f32.mrf.mxu1 }
 0x14a   :  { %v2758_v52 = vadd.f32 %v2757_v36, %v2756_v48  ;;  %v3773_v53 = vpop.f32.mrf.mxu0  ;;  %v3040_v31 = vadd.f32 %v3039_v19, %v3038_v49  ;;  %v2765_v36 = vsel %vm2636_vm2, %v2442_v1, 0.0  ;;  %v2572_v29 = vmax.f32 %v2125_v41, 0.0 }
 0x14b   :  { %v2761_v13 = vsel %vm2636_vm2, %v2440_v44, 0.0  ;;  %v2443_v37 = vmax.f32 %v3773_v53, 0.0  ;;  %v3043_v44 = vsel %vm2636_vm2, %v2571_v18, 0.0  ;;  %v2574_v53 = vmax.f32 %v3904_v32, 0.0  ;;  %v3905_v55 = vpop.f32.mrf.mxu1 }
 0x14c   :  { %v2760_v5 = vadd.f32 %v2759_v61, %v2758_v52  ;;  %v1600_v10 = vpop.f32.mrf.mxu0  ;;  %v3042_v52 = vadd.f32 %v3041_v14, %v3040_v31  ;;  %v3051_v1 = vsel %vm2636_vm2, %v2572_v29, 0.0  ;;  %v2703_v18 = vadd.f32 %v2702_v38, %v2701_v21 }
 0x14d   :  { %v2441_v6 = vmax.f32 %v1600_v10, 0.0  ;;  %v2767_v58 = vsel %vm2636_vm2, %v2443_v37, 0.0  ;;  %v2128_v12 = vpop.f32.mrf.mxu1  ;;  %v3054_v49 = vsel %vm2636_vm2, %v2574_v53, 0.0 }
 0x14e   :  { %v2762_v22 = vadd.f32 %v2761_v13, %v2760_v5  ;;  %v3776_v23 = vpop.f32.mrf.mxu0  ;;  %v4835_v10 = vadd.f32 %v3043_v44, %v3042_v52  ;;  %v2575_v13 = vmax.f32 %v3905_v55, 0.0  ;;  %v2704_v38 = vrot.slane %v2703_v18, 1 }
 0x14f   :  { %v2763_v27 = vsel %vm2636_vm2, %v2441_v6, 0.0  ;;  %v2446_v62 = vmax.f32 %v3776_v23, 0.0  ;;  %v2573_v6 = vmax.f32 %v2128_v12, 0.0  ;;  %v3908_v32 = vpop.f32.mrf.mxu1 }
 0x150   :  { %v2764_v48 = vadd.f32 %v2763_v27, %v2762_v22  ;;  %v1613_v30 = vpop.f32.mrf.mxu0  ;;  %v3056_v44 = vsel %vm2636_vm2, %v2575_v13, 0.0 }
 0x151   :  { %v2444_v61 = vmax.f32 %v1613_v30, 0.0  ;;  %v3052_v14 = vsel %vm2636_vm2, %v2573_v6, 0.0  ;;  %v2141_v41 = vpop.f32.mrf.mxu1 }
 0x152   :  { %v2766_v46 = vadd.f32 %v2765_v36, %v2764_v48  ;;  %v3777_v43 = vpop.f32.mrf.mxu0  ;;  %v3053_v31 = vadd.f32 %v3052_v14, %v3051_v1  ;;  %v2778_v36 = vsel %vm2636_vm2, %v2446_v62, 0.0  ;;  %v2576_v29 = vmax.f32 %v2141_v41, 0.0 }
 0x153   :  { %v2775_v37 = vsel %vm2636_vm2, %v2444_v61, 0.0  ;;  %v2447_v27 = vmax.f32 %v3777_v43, 0.0  ;;  %v3909_v55 = vpop.f32.mrf.mxu1  ;;  %v2578_v61 = vmax.f32 %v3908_v32, 0.0  ;;  %v2705_v14 = vadd.f32 %v2704_v38, %v2703_v18 }
 0x154   :  { %v2768_v63 = vadd.f32 %v2767_v58, %v2766_v46  ;;  %v1616_v5 = vpop.f32.mrf.mxu0  ;;  %v3055_v43 = vadd.f32 %v3054_v49, %v3053_v31 }
 0x155   :  { %v2445_v4 = vmax.f32 %v1616_v5, 0.0  ;;  %v2780_v58 = vsel %vm2636_vm2, %v2447_v27, 0.0  ;;  %v2144_v6 = vpop.f32.mrf.mxu1 }
 0x156   :  { %v2769_v11 = vrot.slane %v2768_v63, 4  ;;  %v3780_v22 = vpop.f32.mrf.mxu0  ;;  %v3057_v62 = vadd.f32 %v3056_v44, %v3055_v43 }
 0x157   :  { %v2776_v23 = vsel %vm2636_vm2, %v2445_v4, 0.0  ;;  %v2450_v12 = vmax.f32 %v3780_v22, 0.0  ;;  %v3912_v27 = vpop.f32.mrf.mxu1  ;;  %v3062_v22 = vsel %vm2636_vm2, %v2578_v61, 0.0 }
 0x158   :  { %v2770_v19 = vadd.f32 %v2769_v11, %v2768_v63  ;;  %v2777_v48 = vadd.f32 %v2776_v23, %v2775_v37  ;;  %v1629_v30 = vpop.f32.mrf.mxu0  ;;  %v3058_v63 = vsel %vm2636_vm2, %v2576_v29, 0.0  ;;  %v2579_v37 = vmax.f32 %v3909_v55, 0.0 }
 0x159   :  { %v2448_v21 = vmax.f32 %v1629_v30, 0.0  ;;  %v2577_v23 = vmax.f32 %v2144_v6, 0.0  ;;  %v3059_v31 = vadd.f32 %v3058_v63, %v3057_v62  ;;  %v2786_v18 = vsel %vm2636_vm2, %v2450_v12, 0.0 }
 0x15a   :  { %v2771_v46 = vrot.slane %v2770_v19, 2  ;;  %v2779_v52 = vadd.f32 %v2778_v36, %v2777_v48  ;;  %v3781_v53 = vpop.f32.mrf.mxu0  ;;  %v3189_v55 = vmul.f32 0.00390625, %v2705_v14 }
 0x15b   :  { %v2782_v13 = vsel %vm2636_vm2, %v2448_v21, 0.0  ;;  %v2451_v32 = vmax.f32 %v3781_v53, 0.0 }
 0x15c   :  { %v2772_v5 = vadd.f32 %v2771_v46, %v2770_v19  ;;  %v2781_v4 = vadd.f32 %v2780_v58, %v2779_v52  ;;  %v1632_v1 = vpop.f32.mrf.mxu0  ;;  %v3060_v19 = vsel %vm2636_vm2, %v2577_v23, 0.0  ;;  %v2157_v46 = vpop.f32.mrf.mxu1  ;;  %v3064_v52 = vsel %vm2636_vm2, %v2579_v37, 0.0 }
 0x15d   :  { %v2449_v11 = vmax.f32 %v1632_v1, 0.0  ;;  %v3061_v29 = vadd.f32 %v3060_v19, %v3059_v31  ;;  %v2580_v43 = vmax.f32 %v2157_v46, 0.0  ;;  %v2788_v1 = vsel %vm2636_vm2, %v2451_v32, 0.0 }
 0x15e   :  { %v2773_v48 = vrot.slane %v2772_v5, 1  ;;  %v2783_v49 = vadd.f32 %v2782_v13, %v2781_v4  ;;  %v3784_v30 = vpop.f32.mrf.mxu0  ;;  %v3913_v61 = vpop.f32.mrf.mxu1 }
 0x15f   :  { %v2784_v41 = vsel %vm2636_vm2, %v2449_v11, 0.0  ;;  %v3063_v4 = vadd.f32 %v3062_v22, %v3061_v29  ;;  %v3066_v62 = vsel %vm2636_vm2, %v2580_v43, 0.0  ;;  %v2454_v13 = vmax.f32 %v3784_v30, 0.0 }
 0x160   :  { %v2774_v36 = vadd.f32 %v2773_v48, %v2772_v5  ;;  %v2785_v44 = vadd.f32 %v2784_v41, %v2783_v49  ;;  %v1645_v21 = vpop.f32.mrf.mxu0  ;;  %v2582_v5 = vmax.f32 %v3912_v27, 0.0  ;;  %v2160_v37 = vpop.f32.mrf.mxu1  ;;  %v2583_v49 = vmax.f32 %v3913_v61, 0.0 }
 0x161   :  { %v2452_v38 = vmax.f32 %v1645_v21, 0.0  ;;  %v3065_v23 = vadd.f32 %v3064_v52, %v3063_v4  ;;  %v2581_v31 = vmax.f32 %v2160_v37, 0.0 }
 0x162   :  { %v3190_v53 = vmul.f32 0.00390625, %v2774_v36  ;;  %v2787_v58 = vadd.f32 %v2786_v18, %v2785_v44  ;;  %v3785_v63 = vpop.f32.mrf.mxu0  ;;  %v3916_v32 = vpop.f32.mrf.mxu1  ;;  %v3070_v44 = vsel %vm2636_vm2, %v2582_v5, 0.0  ;;  %v3072_v43 = vsel %vm2636_vm2, %v2583_v49, 0.0 }
 0x163   :  { %v2790_v14 = vsel %vm2636_vm2, %v2452_v38, 0.0  ;;  %v3067_v19 = vadd.f32 %v3066_v62, %v3065_v23  ;;  %v2455_v27 = vmax.f32 %v3785_v63, 0.0  ;;  %v3068_v30 = vsel %vm2636_vm2, %v2581_v31, 0.0 }
 0x164   :  { %v4855_v6 = vsel %vm3216_vm3, %v3190_v53, %v3189_v55  ;;  %v2789_v12 = vadd.f32 %v2788_v1, %v2787_v58  ;;  %v1648_v11 = vpop.f32.mrf.mxu0  ;;  %v2173_v18 = vpop.f32.mrf.mxu1  ;;  %v2794_v38 = vsel %vm2636_vm2, %v2454_v13, 0.0  ;;  %v2586_v1 = vmax.f32 %v3916_v32, 0.0 }
 0x165   :  { %v2453_v48 = vmax.f32 %v1648_v11, 0.0  ;;  %v3069_v46 = vadd.f32 %v3068_v30, %v3067_v19  ;;  %v2584_v55 = vmax.f32 %v2173_v18, 0.0  ;;  %v2796_v61 = vsel %vm2636_vm2, %v2455_v27, 0.0 }
 0x166   :  { %v2791_v41 = vadd.f32 %v2790_v14, %v2789_v12  ;;  %v3788_v22 = vpop.f32.mrf.mxu0  ;;  %v3917_v63 = vpop.f32.mrf.mxu1  ;;  %v3078_v32 = vsel %vm2636_vm2, %v2586_v1, 0.0 }
 0x167   :  { %v2792_v36 = vsel %vm2636_vm2, %v2453_v48, 0.0  ;;  %v3071_v4 = vadd.f32 %v3070_v44, %v3069_v46  ;;  %v3074_v5 = vsel %vm2636_vm2, %v2584_v55, 0.0  ;;  %v2458_v62 = vmax.f32 %v3788_v22, 0.0 }
 0x168   :  { %v2793_v21 = vadd.f32 %v2792_v36, %v2791_v41  ;;  %v1661_v29 = vpop.f32.mrf.mxu0  ;;  %v2176_v37 = vpop.f32.mrf.mxu1  ;;  %v2587_v48 = vmax.f32 %v3917_v63, 0.0 }
 0x169   :  { %v2456_v52 = vmax.f32 %v1661_v29, 0.0  ;;  %v3073_v23 = vadd.f32 %v3072_v43, %v3071_v4  ;;  %v2585_v49 = vmax.f32 %v2176_v37, 0.0  ;;  %v2802_v18 = vsel %vm2636_vm2, %v2458_v62, 0.0 }
 0x16a   :  { %v2795_v53 = vadd.f32 %v2794_v38, %v2793_v21  ;;  %v3789_v58 = vpop.f32.mrf.mxu0  ;;  %v3920_v36 = vpop.f32.mrf.mxu1 }
 0x16b   :  { %v2798_v13 = vsel %vm2636_vm2, %v2456_v52, 0.0  ;;  %v3075_v19 = vadd.f32 %v3074_v5, %v3073_v23  ;;  %v2459_v44 = vmax.f32 %v3789_v58, 0.0  ;;  %v3076_v22 = vsel %vm2636_vm2, %v2585_v49, 0.0 }
 0x16c   :  { %v2797_v12 = vadd.f32 %v2796_v61, %v2795_v53  ;;  %v1664_v11 = vpop.f32.mrf.mxu0  ;;  %v2189_v46 = vpop.f32.mrf.mxu1  ;;  %v3080_v52 = vsel %vm2636_vm2, %v2587_v48, 0.0  ;;  %v2590_v61 = vmax.f32 %v3920_v36, 0.0 }
 0x16d   :  { %v2457_v14 = vmax.f32 %v1664_v11, 0.0  ;;  %v3077_v29 = vadd.f32 %v3076_v22, %v3075_v19  ;;  %v2588_v43 = vmax.f32 %v2189_v46, 0.0  ;;  %v2804_v63 = vsel %vm2636_vm2, %v2459_v44, 0.0 }
 0x16e   :  { %v2799_v31 = vadd.f32 %v2798_v13, %v2797_v12  ;;  %v3792_v41 = vpop.f32.mrf.mxu0  ;;  %v3921_v58 = vpop.f32.mrf.mxu1  ;;  %v3086_v36 = vsel %vm2636_vm2, %v2590_v61, 0.0 }
 0x16f   :  { %v2800_v27 = vsel %vm2636_vm2, %v2457_v14, 0.0  ;;  %v3079_v4 = vadd.f32 %v3078_v32, %v3077_v29  ;;  %v3082_v1 = vsel %vm2636_vm2, %v2588_v43, 0.0  ;;  %v2462_v5 = vmax.f32 %v3792_v41, 0.0 }
 0x170   :  { %v2801_v30 = vadd.f32 %v2800_v27, %v2799_v31  ;;  %v1677_v21 = vpop.f32.mrf.mxu0  ;;  %v2192_v37 = vpop.f32.mrf.mxu1  ;;  %v2591_v14 = vmax.f32 %v3921_v58, 0.0 }
 0x171   :  { %v2460_v38 = vmax.f32 %v1677_v21, 0.0  ;;  %v3081_v23 = vadd.f32 %v3080_v52, %v3079_v4  ;;  %v2589_v48 = vmax.f32 %v2192_v37, 0.0  ;;  %v2810_v46 = vsel %vm2636_vm2, %v2462_v5, 0.0 }
 0x172   :  { %v2803_v55 = vadd.f32 %v2802_v18, %v2801_v30  ;;  %v3793_v53 = vpop.f32.mrf.mxu0  ;;  %v3924_v27 = vpop.f32.mrf.mxu1 }
 0x173   :  { %v2806_v62 = vsel %vm2636_vm2, %v2460_v38, 0.0  ;;  %v3083_v19 = vadd.f32 %v3082_v1, %v3081_v23  ;;  %v2463_v32 = vmax.f32 %v3793_v53, 0.0  ;;  %v3084_v41 = vsel %vm2636_vm2, %v2589_v48, 0.0 }
 0x174   :  { %v2805_v12 = vadd.f32 %v2804_v63, %v2803_v55  ;;  %v1680_v11 = vpop.f32.mrf.mxu0  ;;  %v2205_v29 = vpop.f32.mrf.mxu1  ;;  %v3088_v38 = vsel %vm2636_vm2, %v2591_v14, 0.0  ;;  %v2594_v63 = vmax.f32 %v3924_v27, 0.0 }
 0x175   :  { %v2461_v13 = vmax.f32 %v1680_v11, 0.0  ;;  %v3085_v21 = vadd.f32 %v3084_v41, %v3083_v19  ;;  %v2592_v52 = vmax.f32 %v2205_v29, 0.0  ;;  %v2812_v58 = vsel %vm2636_vm2, %v2463_v32, 0.0 }
 0x176   :  { %v2807_v49 = vadd.f32 %v2806_v62, %v2805_v12  ;;  %v3796_v31 = vpop.f32.mrf.mxu0  ;;  %v3925_v53 = vpop.f32.mrf.mxu1  ;;  %v3094_v27 = vsel %vm2636_vm2, %v2594_v63, 0.0 }
 0x177   :  { %v2808_v44 = vsel %vm2636_vm2, %v2461_v13, 0.0  ;;  %v3087_v4 = vadd.f32 %v3086_v36, %v3085_v21  ;;  %v3090_v61 = vsel %vm2636_vm2, %v2592_v52, 0.0  ;;  %v2466_v1 = vmax.f32 %v3796_v31, 0.0 }
 0x178   :  { %v2809_v22 = vadd.f32 %v2808_v44, %v2807_v49  ;;  %v1693_v30 = vpop.f32.mrf.mxu0  ;;  %v2208_v37 = vpop.f32.mrf.mxu1  ;;  %v2595_v13 = vmax.f32 %v3925_v53, 0.0  ;;  %v3197_v53 = vld [vmem:[%s5069_s2] sm:$0xff] }
 0x179   :  { %v2464_v18 = vmax.f32 %v1693_v30, 0.0  ;;  %v3089_v23 = vadd.f32 %v3088_v38, %v3087_v4  ;;  %v2593_v14 = vmax.f32 %v2208_v37, 0.0  ;;  %v2818_v29 = vsel %vm2636_vm2, %v2466_v1, 0.0  ;;  %3973 = vmatpush3.msra.mxu1 %v3197_v53 }
 0x17a   :  { %v2811_v43 = vadd.f32 %v2810_v46, %v2809_v22  ;;  %v3797_v55 = vpop.f32.mrf.mxu0  ;;  %v3928_v44 = vpop.f32.mrf.mxu1 }
 0x17b   :  { %v2814_v5 = vsel %vm2636_vm2, %v2464_v18, 0.0  ;;  %v3091_v19 = vadd.f32 %v3090_v61, %v3089_v23  ;;  %v2467_v36 = vmax.f32 %v3797_v55, 0.0  ;;  %v3092_v31 = vsel %vm2636_vm2, %v2593_v14, 0.0 }
 0x17c   :  { %v2813_v12 = vadd.f32 %v2812_v58, %v2811_v43  ;;  %v1696_v11 = vpop.f32.mrf.mxu0  ;;  %v2221_v21 = vpop.f32.mrf.mxu1  ;;  %v3096_v18 = vsel %vm2636_vm2, %v2595_v13, 0.0  ;;  %v2598_v63 = vmax.f32 %v3928_v44, 0.0 }
 0x17d   :  { %v2465_v62 = vmax.f32 %v1696_v11, 0.0  ;;  %v3093_v30 = vadd.f32 %v3092_v31, %v3091_v19  ;;  %v2596_v38 = vmax.f32 %v2221_v21, 0.0  ;;  %v2820_v58 = vsel %vm2636_vm2, %v2467_v36, 0.0 }
 0x17e   :  { %v2815_v48 = vadd.f32 %v2814_v5, %v2813_v12  ;;  %v3800_v49 = vpop.f32.mrf.mxu0  ;;  %v3929_v55 = vpop.f32.mrf.mxu1  ;;  %v3102_v31 = vsel %vm2636_vm2, %v2598_v63, 0.0 }
 0x17f   :  { %v2816_v32 = vsel %vm2636_vm2, %v2465_v62, 0.0  ;;  %v3095_v4 = vadd.f32 %v3094_v27, %v3093_v30  ;;  %v3098_v61 = vsel %vm2636_vm2, %v2596_v38, 0.0  ;;  %v2470_v1 = vmax.f32 %v3800_v49, 0.0 }
 0x180   :  { %v2817_v41 = vadd.f32 %v2816_v32, %v2815_v48  ;;  %v1709_v22 = vpop.f32.mrf.mxu0  ;;  %v2224_v37 = vpop.f32.mrf.mxu1  ;;  %v2599_v13 = vmax.f32 %v3929_v55, 0.0 }
 0x181   :  { %v2468_v46 = vmax.f32 %v1709_v22, 0.0  ;;  %v3097_v23 = vadd.f32 %v3096_v18, %v3095_v4  ;;  %v2597_v14 = vmax.f32 %v2224_v37, 0.0  ;;  %v2826_v21 = vsel %vm2636_vm2, %v2470_v1, 0.0 }
 0x182   :  { %v2819_v52 = vadd.f32 %v2818_v29, %v2817_v41  ;;  %v3801_v43 = vpop.f32.mrf.mxu0  ;;  %v3932_v44 = vpop.f32.mrf.mxu1 }
 0x183   :  { %v2822_v5 = vsel %vm2636_vm2, %v2468_v46, 0.0  ;;  %v3099_v36 = vadd.f32 %v3098_v61, %v3097_v23  ;;  %v2471_v32 = vmax.f32 %v3801_v43, 0.0  ;;  %v3100_v28 = vsel %vm2636_vm2, %v2597_v14, 0.0 }
 0x184   :  { %v2821_v12 = vadd.f32 %v2820_v58, %v2819_v52  ;;  %v1712_v11 = vpop.f32.mrf.mxu0  ;;  %v2237_v30 = vpop.f32.mrf.mxu1  ;;  %v3104_v46 = vsel %vm2636_vm2, %v2599_v13, 0.0  ;;  %v2602_v53 = vmax.f32 %v3932_v44, 0.0 }
 0x185   :  { %v2469_v62 = vmax.f32 %v1712_v11, 0.0  ;;  %v3101_v22 = vadd.f32 %v3100_v28, %v3099_v36  ;;  %v2600_v18 = vmax.f32 %v2237_v30, 0.0  ;;  %v2828_v55 = vsel %vm2636_vm2, %v2471_v32, 0.0 }
 0x186   :  { %v2823_v48 = vadd.f32 %v2822_v5, %v2821_v12  ;;  %v3804_v19 = vpop.f32.mrf.mxu0  ;;  %v3933_v43 = vpop.f32.mrf.mxu1  ;;  %v3110_v44 = vsel %vm2636_vm2, %v2602_v53, 0.0 }
 0x187   :  { %v2824_v27 = vsel %vm2636_vm2, %v2469_v62, 0.0  ;;  %v3103_v4 = vadd.f32 %v3102_v31, %v3101_v22  ;;  %v3106_v58 = vsel %vm2636_vm2, %v2600_v18, 0.0  ;;  %v2474_v63 = vmax.f32 %v3804_v19, 0.0 }
 0x188   :  { %v2825_v49 = vadd.f32 %v2824_v27, %v2823_v48  ;;  %v1725_v41 = vpop.f32.mrf.mxu0  ;;  %v2240_v23 = vpop.f32.mrf.mxu1  ;;  %v2603_v5 = vmax.f32 %v3933_v43, 0.0 }
 0x189   :  { %v2472_v29 = vmax.f32 %v1725_v41, 0.0  ;;  %v3105_v11 = vadd.f32 %v3104_v46, %v3103_v4  ;;  %v2601_v62 = vmax.f32 %v2240_v23, 0.0  ;;  %v2834_v22 = vsel %vm2636_vm2, %v2474_v63, 0.0 }
 0x18a   :  { %v2827_v38 = vadd.f32 %v2826_v21, %v2825_v49  ;;  %v3805_v52 = vpop.f32.mrf.mxu0  ;;  %v3936_v36 = vpop.f32.mrf.mxu1  ;;  %v3112_v30 = vsel %vm2636_vm2, %v2603_v5, 0.0 }
 0x18b   :  { %v2830_v1 = vsel %vm2636_vm2, %v2472_v29, 0.0  ;;  %v3107_v48 = vadd.f32 %v3106_v58, %v3105_v11  ;;  %v2475_v27 = vmax.f32 %v3805_v52, 0.0  ;;  %v3108_v19 = vsel %vm2636_vm2, %v2601_v62, 0.0 }
 0x18c   :  { %v2829_v61 = vadd.f32 %v2828_v55, %v2827_v38  ;;  %v1728_v12 = vpop.f32.mrf.mxu0  ;;  %v2253_v41 = vpop.f32.mrf.mxu1  ;;  %v2606_v38 = vmax.f32 %v3936_v36, 0.0 }
 0x18d   :  { %v2473_v37 = vmax.f32 %v1728_v12, 0.0  ;;  %v3109_v49 = vadd.f32 %v3108_v19, %v3107_v48  ;;  %v2604_v21 = vmax.f32 %v2253_v41, 0.0  ;;  %v2836_v4 = vsel %vm2636_vm2, %v2475_v27, 0.0 }
 0x18e   :  { %v2831_v13 = vadd.f32 %v2830_v1, %v2829_v61  ;;  %v3808_v14 = vpop.f32.mrf.mxu0  ;;  %v3937_v52 = vpop.f32.mrf.mxu1  ;;  %v3123_v62 = vsel %vm2636_vm2, %v2606_v38, 0.0 }
 0x18f   :  { %v2832_v32 = vsel %vm2636_vm2, %v2473_v37, 0.0  ;;  %v3111_v18 = vadd.f32 %v3110_v44, %v3109_v49  ;;  %v2478_v53 = vmax.f32 %v3808_v14, 0.0  ;;  %v3120_v63 = vsel %vm2636_vm2, %v2604_v21, 0.0 }
 0x190   :  { %v2833_v31 = vadd.f32 %v2832_v32, %v2831_v13  ;;  %v1741_v28 = vpop.f32.mrf.mxu0  ;;  %v2256_v12 = vpop.f32.mrf.mxu1  ;;  %v2607_v23 = vmax.f32 %v3937_v52, 0.0 }
 0x191   :  { %v2476_v43 = vmax.f32 %v1741_v28, 0.0  ;;  %v4908_v61 = vadd.f32 %v3112_v30, %v3111_v18  ;;  %v2605_v1 = vmax.f32 %v2256_v12, 0.0  ;;  %v2847_v49 = vsel %vm2636_vm2, %v2478_v53, 0.0 }
 0x192   :  { %v2835_v29 = vadd.f32 %v2834_v22, %v2833_v31  ;;  %v3809_v46 = vpop.f32.mrf.mxu0  ;;  %v3940_v13 = vpop.f32.mrf.mxu1  ;;  %v3125_v22 = vsel %vm2636_vm2, %v2607_v23, 0.0 }
 0x193   :  { %v2844_v48 = vsel %vm2636_vm2, %v2476_v43, 0.0  ;;  %v2479_v36 = vmax.f32 %v3809_v46, 0.0  ;;  %v3121_v14 = vsel %vm2636_vm2, %v2605_v1, 0.0 }
 0x194   :  { %v2837_v55 = vadd.f32 %v2836_v4, %v2835_v29  ;;  %v1744_v58 = vpop.f32.mrf.mxu0  ;;  %v3122_v31 = vadd.f32 %v3121_v14, %v3120_v63  ;;  %v2269_v28 = vpop.f32.mrf.mxu1  ;;  %v2610_v14 = vmax.f32 %v3940_v13, 0.0 }
 0x195   :  { %v2477_v11 = vmax.f32 %v1744_v58, 0.0  ;;  %v2608_v30 = vmax.f32 %v2269_v28, 0.0  ;;  %v2849_v52 = vsel %vm2636_vm2, %v2479_v36, 0.0 }
 0x196   :  { %v2838_v37 = vrot.slane %v2837_v55, 4  ;;  %v3812_v5 = vpop.f32.mrf.mxu0  ;;  %v3124_v38 = vadd.f32 %v3123_v62, %v3122_v31  ;;  %v3941_v46 = vpop.f32.mrf.mxu1 }
 0x197   :  { %v2845_v27 = vsel %vm2636_vm2, %v2477_v11, 0.0  ;;  %v3127_v4 = vsel %vm2636_vm2, %v2608_v30, 0.0  ;;  %v2482_v63 = vmax.f32 %v3812_v5, 0.0 }
 0x198   :  { %v2839_v32 = vadd.f32 %v2838_v37, %v2837_v55  ;;  %v2846_v44 = vadd.f32 %v2845_v27, %v2844_v48  ;;  %v1757_v19 = vpop.f32.mrf.mxu0  ;;  %v3126_v12 = vadd.f32 %v3125_v22, %v3124_v38  ;;  %v2272_v11 = vpop.f32.mrf.mxu1  ;;  %v3131_v38 = vsel %vm2636_vm2, %v2610_v14, 0.0 }
 0x199   :  { %v2480_v41 = vmax.f32 %v1757_v19, 0.0  ;;  %v2609_v23 = vmax.f32 %v2272_v11, 0.0 }
 0x19a   :  { %v2840_v21 = vrot.slane %v2839_v32, 2  ;;  %v2848_v29 = vadd.f32 %v2847_v49, %v2846_v44  ;;  %v3813_v18 = vpop.f32.mrf.mxu0  ;;  %v3128_v62 = vadd.f32 %v3127_v4, %v3126_v12  ;;  %v4920_v44 = vpop.f32.mrf.mxu1 }
 0x19b   :  { %v2851_v53 = vsel %vm2636_vm2, %v2480_v41, 0.0  ;;  %v2483_v36 = vmax.f32 %v3813_v18, 0.0  ;;  %v2855_v41 = vsel %vm2636_vm2, %v2482_v63, 0.0 }
 0x19c   :  { %v2841_v43 = vadd.f32 %v2840_v21, %v2839_v32  ;;  %v2850_v55 = vadd.f32 %v2849_v52, %v2848_v29  ;;  %v1760_v58 = vpop.f32.mrf.mxu0  ;;  %v3129_v32 = vsel %vm2636_vm2, %v2609_v23, 0.0  ;;  %v2285_v5 = vpop.f32.mrf.mxu1  ;;  %v2611_v52 = vmax.f32 %v3941_v46, 0.0 }
 0x19d   :  { %v2481_v1 = vmax.f32 %v1760_v58, 0.0  ;;  %v3130_v30 = vadd.f32 %v3129_v32, %v3128_v62  ;;  %v2857_v18 = vsel %vm2636_vm2, %v2483_v36, 0.0 }
 0x19e   :  { %v2842_v37 = vrot.slane %v2841_v43, 1  ;;  %v2852_v48 = vadd.f32 %v2851_v53, %v2850_v55  ;;  %v3816_v27 = vpop.f32.mrf.mxu0  ;;  %v3945_v4 = vpop.f32.mrf.mxu1 }
 0x19f   :  { %v2853_v19 = vsel %vm2636_vm2, %v2481_v1, 0.0  ;;  %v2486_v12 = vmax.f32 %v3816_v27, 0.0  ;;  %v3132_v53 = vadd.f32 %v3131_v38, %v3130_v30 }
 0x1a0   :  { %v2843_v31 = vadd.f32 %v2842_v37, %v2841_v43  ;;  %v2854_v28 = vadd.f32 %v2853_v19, %v2852_v48  ;;  %v1773_v49 = vpop.f32.mrf.mxu0  ;;  %v3133_v37 = vsel %vm2636_vm2, %v2611_v52, 0.0  ;;  %v2612_v48 = vmax.f32 %v2285_v5, 0.0  ;;  %v2288_v62 = vpop.f32.mrf.mxu1 }
 0x1a1   :  { %v2484_v22 = vmax.f32 %v1773_v49, 0.0 }
 0x1a2   :  { %v3191_v21 = vmul.f32 0.00390625, %v2843_v31  ;;  %v2856_v29 = vadd.f32 %v2855_v41, %v2854_v28  ;;  %v3817_v13 = vpop.f32.mrf.mxu0  ;;  %v3134_v31 = vadd.f32 %v3133_v37, %v3132_v53  ;;  %v3135_v49 = vsel %vm2636_vm2, %v2612_v48, 0.0  ;;  %v4936_v30 = vpop.f32.mrf.mxu1 }
 0x1a3   :  { %v2859_v11 = vsel %vm2636_vm2, %v2484_v22, 0.0  ;;  %v2487_v14 = vmax.f32 %v3817_v13, 0.0  ;;  %v2613_v41 = vmax.f32 %v2288_v62, 0.0 }
 0x1a4   :  { %v4928_v55 = vsel %vm3218_vm5, %v3191_v21, %v4855_v6  ;;  %v2858_v43 = vadd.f32 %v2857_v18, %v2856_v29  ;;  %v1776_v58 = vpop.f32.mrf.mxu0  ;;  %v2863_v6 = vsel %vm2636_vm2, %v2486_v12, 0.0  ;;  %v3136_v52 = vadd.f32 %v3135_v49, %v3134_v31  ;;  %v2301_v53 = vpop.f32.mrf.mxu1 }
 0x1a5   :  { %v2485_v63 = vmax.f32 %v1776_v58, 0.0  ;;  %v2865_v22 = vsel %vm2636_vm2, %v2487_v14, 0.0  ;;  %v2614_v58 = vmax.f32 %v4920_v44, 0.0  ;;  %v3137_v12 = vsel %vm2636_vm2, %v2613_v41, 0.0 }
 0x1a6   :  { %v2860_v1 = vadd.f32 %v2859_v11, %v2858_v43  ;;  %v3820_v23 = vpop.f32.mrf.mxu0  ;;  %v3949_v44 = vpop.f32.mrf.mxu1 }
 0x1a7   :  { %v2861_v46 = vsel %vm2636_vm2, %v2485_v63, 0.0  ;;  %v2490_v29 = vmax.f32 %v3820_v23, 0.0  ;;  %v3138_v23 = vadd.f32 %v3137_v12, %v3136_v52 }
 0x1a8   :  { %v2862_v36 = vadd.f32 %v2861_v46, %v2860_v1  ;;  %v1789_v19 = vpop.f32.mrf.mxu0  ;;  %v2304_v52 = vpop.f32.mrf.mxu1 }
 0x1a9   :  { %v2488_v32 = vmax.f32 %v1789_v19, 0.0  ;;  %v2871_v48 = vsel %vm2636_vm2, %v2490_v29, 0.0  ;;  %v2615_v19 = vmax.f32 %v3945_v4, 0.0  ;;  %v2616_v29 = vmax.f32 %v2301_v53, 0.0 }
 0x1aa   :  { %v2864_v27 = vadd.f32 %v2863_v6, %v2862_v36  ;;  %v3821_v28 = vpop.f32.mrf.mxu0  ;;  %v3139_v36 = vsel %vm2636_vm2, %v2614_v58, 0.0 }
 0x1ab   :  { %v2867_v13 = vsel %vm2636_vm2, %v2488_v32, 0.0  ;;  %v2491_v11 = vmax.f32 %v3821_v28, 0.0  ;;  %v3140_v41 = vadd.f32 %v3139_v36, %v3138_v23 }
 0x1ac   :  { %v2866_v5 = vadd.f32 %v2865_v22, %v2864_v27  ;;  %v1792_v21 = vpop.f32.mrf.mxu0 }
 0x1ad   :  { %v2489_v38 = vmax.f32 %v1792_v21, 0.0  ;;  %v2873_v6 = vsel %vm2636_vm2, %v2491_v11, 0.0  ;;  %v3141_v21 = vsel %vm2636_vm2, %v2615_v19, 0.0 }
 0x1ae   :  { %v2868_v18 = vadd.f32 %v2867_v13, %v2866_v5  ;;  %v3824_v43 = vpop.f32.mrf.mxu0  ;;  %v3142_v11 = vadd.f32 %v3141_v21, %v3140_v41 }
 0x1af   :  { %v2869_v63 = vsel %vm2636_vm2, %v2489_v38, 0.0  ;;  %v2494_v27 = vmax.f32 %v3824_v43, 0.0 }
 0x1b0   :  { %v2870_v1 = vadd.f32 %v2869_v63, %v2868_v18  ;;  %v1805_v37 = vpop.f32.mrf.mxu0 }
 0x1b1   :  { %v2492_v14 = vmax.f32 %v1805_v37, 0.0  ;;  %v2879_v58 = vsel %vm2636_vm2, %v2494_v27, 0.0  ;;  %v2617_v37 = vmax.f32 %v2304_v52, 0.0 }
 0x1b2   :  { %v2872_v46 = vadd.f32 %v2871_v48, %v2870_v1  ;;  %v3825_v62 = vpop.f32.mrf.mxu0  ;;  %v3143_v1 = vsel %vm2636_vm2, %v2616_v29, 0.0 }
 0x1b3   :  { %v2875_v28 = vsel %vm2636_vm2, %v2492_v14, 0.0  ;;  %v2495_v13 = vmax.f32 %v3825_v62, 0.0  ;;  %v4951_v14 = vpop.f32.mrf.mxu1  ;;  %v3144_v19 = vadd.f32 %v3143_v1, %v3142_v11  ;;  %v3145_v27 = vsel %vm2636_vm2, %v2617_v37, 0.0 }
 0x1b4   :  { %v2874_v32 = vadd.f32 %v2873_v6, %v2872_v46  ;;  %v1808_v31 = vpop.f32.mrf.mxu0 }
 0x1b5   :  { %v2493_v49 = vmax.f32 %v1808_v31, 0.0  ;;  %v2881_v48 = vsel %vm2636_vm2, %v2495_v13, 0.0  ;;  %v2618_v31 = vmax.f32 %v4936_v30, 0.0  ;;  %v2317_v41 = vpop.f32.mrf.mxu1 }
 0x1b6   :  { %v2876_v22 = vadd.f32 %v2875_v28, %v2874_v32  ;;  %v3828_v5 = vpop.f32.mrf.mxu0 }
 0x1b7   :  { %v2877_v38 = vsel %vm2636_vm2, %v2493_v49, 0.0  ;;  %v2498_v46 = vmax.f32 %v3828_v5, 0.0  ;;  %v3146_v5 = vadd.f32 %v3145_v27, %v3144_v19  ;;  %v3953_v30 = vpop.f32.mrf.mxu1 }
 0x1b8   :  { %v2878_v4 = vadd.f32 %v2877_v38, %v2876_v22  ;;  %v1821_v18 = vpop.f32.mrf.mxu0 }
 0x1b9   :  { %v2496_v12 = vmax.f32 %v1821_v18, 0.0  ;;  %v2887_v29 = vsel %vm2636_vm2, %v2498_v46, 0.0  ;;  %v2619_v18 = vmax.f32 %v3949_v44, 0.0  ;;  %v2620_v46 = vmax.f32 %v2317_v41, 0.0  ;;  %v2320_v19 = vpop.f32.mrf.mxu1 }
 0x1ba   :  { %v2880_v43 = vadd.f32 %v2879_v58, %v2878_v4  ;;  %v3829_v63 = vpop.f32.mrf.mxu0  ;;  %v3147_v4 = vsel %vm2636_vm2, %v2618_v31, 0.0 }
 0x1bb   :  { %v2883_v62 = vsel %vm2636_vm2, %v2496_v12, 0.0  ;;  %v2499_v28 = vmax.f32 %v3829_v63, 0.0  ;;  %v3148_v37 = vadd.f32 %v3147_v4, %v3146_v5 }
 0x1bc   :  { %v2882_v53 = vadd.f32 %v2881_v48, %v2880_v43  ;;  %v1824_v23 = vpop.f32.mrf.mxu0 }
 0x1bd   :  { %v2497_v36 = vmax.f32 %v1824_v23, 0.0  ;;  %v2889_v58 = vsel %vm2636_vm2, %v2499_v28, 0.0  ;;  %v3149_v23 = vsel %vm2636_vm2, %v2619_v18, 0.0 }
 0x1be   :  { %v2884_v6 = vadd.f32 %v2883_v62, %v2882_v53  ;;  %v3832_v32 = vpop.f32.mrf.mxu0  ;;  %v3150_v28 = vadd.f32 %v3149_v23, %v3148_v37 }
 0x1bf   :  { %v2885_v49 = vsel %vm2636_vm2, %v2497_v36, 0.0  ;;  %v2502_v43 = vmax.f32 %v3832_v32, 0.0 }
 0x1c0   :  { %v2886_v22 = vadd.f32 %v2885_v49, %v2884_v6  ;;  %v1837_v21 = vpop.f32.mrf.mxu0 }
 0x1c1   :  { %v2500_v13 = vmax.f32 %v1837_v21, 0.0  ;;  %v2895_v31 = vsel %vm2636_vm2, %v2502_v43, 0.0  ;;  %v2621_v21 = vmax.f32 %v2320_v19, 0.0 }
 0x1c2   :  { %v2888_v38 = vadd.f32 %v2887_v29, %v2886_v22  ;;  %v3833_v52 = vpop.f32.mrf.mxu0  ;;  %v3151_v22 = vsel %vm2636_vm2, %v2620_v46, 0.0 }
 0x1c3   :  { %v2891_v63 = vsel %vm2636_vm2, %v2500_v13, 0.0  ;;  %v2503_v62 = vmax.f32 %v3833_v52, 0.0  ;;  %v4966_v13 = vpop.f32.mrf.mxu1  ;;  %v3152_v18 = vadd.f32 %v3151_v22, %v3150_v28  ;;  %v3153_v43 = vsel %vm2636_vm2, %v2621_v21, 0.0 }
 0x1c4   :  { %v2890_v12 = vadd.f32 %v2889_v58, %v2888_v38  ;;  %v1840_v11 = vpop.f32.mrf.mxu0 }
 0x1c5   :  { %v2501_v1 = vmax.f32 %v1840_v11, 0.0  ;;  %v2897_v29 = vsel %vm2636_vm2, %v2503_v62, 0.0  ;;  %v2622_v11 = vmax.f32 %v4951_v14, 0.0  ;;  %v2333_v37 = vpop.f32.mrf.mxu1  ;;  %v3154_v62 = vadd.f32 %v3153_v43, %v3152_v18 }
 0x1c6   :  { %v2892_v48 = vadd.f32 %v2891_v63, %v2890_v12  ;;  %v3836_v53 = vpop.f32.mrf.mxu0 }
 0x1c7   :  { %v2893_v36 = vsel %vm2636_vm2, %v2501_v1, 0.0  ;;  %v2506_v38 = vmax.f32 %v3836_v53, 0.0  ;;  %v3155_v19 = vsel %vm2636_vm2, %v2622_v11, 0.0  ;;  %v3957_v14 = vpop.f32.mrf.mxu1 }
 0x1c8   :  { %v2894_v44 = vadd.f32 %v2893_v36, %v2892_v48  ;;  %v1853_v6 = vpop.f32.mrf.mxu0  ;;  %v3156_v22 = vadd.f32 %v3155_v19, %v3154_v62 }
 0x1c9   :  { %v2504_v27 = vmax.f32 %v1853_v6, 0.0  ;;  %v2903_v46 = vsel %vm2636_vm2, %v2506_v38, 0.0 }
 0x1ca   :  { %v2896_v32 = vadd.f32 %v2895_v31, %v2894_v44  ;;  %v3837_v49 = vpop.f32.mrf.mxu0  ;;  %v2623_v44 = vmax.f32 %v3953_v30, 0.0 }
 0x1cb   :  { %v2899_v52 = vsel %vm2636_vm2, %v2504_v27, 0.0  ;;  %v2507_v63 = vmax.f32 %v3837_v49, 0.0 }
 0x1cc   :  { %v2898_v41 = vadd.f32 %v2897_v29, %v2896_v32  ;;  %v1856_v5 = vpop.f32.mrf.mxu0  ;;  %v3157_v29 = vsel %vm2636_vm2, %v2623_v44, 0.0 }
 0x1cd   :  { %v2505_v4 = vmax.f32 %v1856_v5, 0.0  ;;  %v2905_v6 = vsel %vm2636_vm2, %v2507_v63, 0.0  ;;  %v3158_v43 = vadd.f32 %v3157_v29, %v3156_v22 }
 0x1ce   :  { %v2900_v58 = vadd.f32 %v2899_v52, %v2898_v41  ;;  %v3840_v12 = vpop.f32.mrf.mxu0  ;;  %v2624_v41 = vmax.f32 %v2333_v37, 0.0  ;;  %v2513_v37 = vmax.f32 %v4597_v9, 0.0 }
 0x1cf   :  { %v2901_v1 = vsel %vm2636_vm2, %v2505_v4, 0.0  ;;  %v2510_v32 = vmax.f32 %v3840_v12, 0.0  ;;  %v2336_v4 = vpop.f32.mrf.mxu1 }
 0x1d0   :  { %v2902_v48 = vadd.f32 %v2901_v1, %v2900_v58  ;;  %v1869_v23 = vpop.f32.mrf.mxu0  ;;  %v2512_v58 = vmax.f32 %v4579_v60, 0.0  ;;  %v3159_v1 = vsel %vm2636_vm2, %v2624_v41, 0.0  ;;  %v2922_v9 = vsel %vm2636_vm2, %v2513_v37, 0.0 }
 0x1d1   :  { %v2508_v31 = vmax.f32 %v1869_v23, 0.0  ;;  %v2916_v11 = vsel %vm2636_vm2, %v2510_v32, 0.0  ;;  %v3160_v19 = vadd.f32 %v3159_v1, %v3158_v43 }
 0x1d2   :  { %v2904_v53 = vadd.f32 %v2903_v46, %v2902_v48  ;;  %v3841_v36 = vpop.f32.mrf.mxu0  ;;  %v2625_v48 = vmax.f32 %v2336_v4, 0.0  ;;  %v4983_v46 = vpop.f32.mrf.mxu1  ;;  %v2920_v60 = vsel %vm2636_vm2, %v2512_v58, 0.0  ;;  %v2518_v58 = vmax.f32 %v4601_v15, 0.0 }
 0x1d3   :  { %v2913_v5 = vsel %vm2636_vm2, %v2508_v31, 0.0  ;;  %v2511_v38 = vmax.f32 %v3841_v36, 0.0  ;;  %v2514_v36 = vmax.f32 %v4572_v54, 0.0  ;;  %v2626_v31 = vmax.f32 %v4966_v13, 0.0 }
 0x1d4   :  { %v2906_v27 = vadd.f32 %v2905_v6, %v2904_v53  ;;  %v1872_v28 = vpop.f32.mrf.mxu0  ;;  %v2349_v32 = vpop.f32.mrf.mxu1  ;;  %v2516_v54 = vmax.f32 %v4607_v20, 0.0  ;;  %v2627_v13 = vmax.f32 %v3957_v14, 0.0  ;;  %v2519_v14 = vmax.f32 %v4613_v26, 0.0 }
 0x1d5   :  { %v2509_v49 = vmax.f32 %v1872_v28, 0.0  ;;  %v2918_v23 = vsel %vm2636_vm2, %v2511_v38, 0.0  ;;  %v2515_v28 = vmax.f32 %v4585_v2, 0.0  ;;  %v3163_v38 = vsel %vm2636_vm2, %v2626_v31, 0.0 }
 0x1d6   :  { %v2907_v21 = vrot.slane %v2906_v27, 4  ;;  %v2517_v2 = vmax.f32 %v4625_v34, 0.0  ;;  %v3961_v4 = vpop.f32.mrf.mxu1  ;;  %v2928_v20 = vsel %vm2636_vm2, %v2516_v54, 0.0  ;;  %v2932_v37 = vsel %vm2636_vm2, %v2518_v58, 0.0 }
 0x1d7   :  { %v2914_v52 = vsel %vm2636_vm2, %v2509_v49, 0.0  ;;  %v2522_v26 = vmax.f32 %v4629_v40, 0.0 }
 0x1d8   :  { %v2908_v30 = vadd.f32 %v2907_v21, %v2906_v27  ;;  %v2915_v18 = vadd.f32 %v2914_v52, %v2913_v5  ;;  %v3161_v27 = vsel %vm2636_vm2, %v2625_v48, 0.0  ;;  %v2924_v21 = vsel %vm2636_vm2, %v2514_v36, 0.0  ;;  %v2352_v48 = vpop.f32.mrf.mxu1 }
 0x1d9   :  { %v3162_v29 = vadd.f32 %v3161_v27, %v3160_v19  ;;  %v2926_v52 = vsel %vm2636_vm2, %v2515_v28, 0.0  ;;  %v2930_v1 = vsel %vm2636_vm2, %v2517_v2, 0.0  ;;  %v2934_v36 = vsel %vm2636_vm2, %v2519_v14, 0.0 }
 0x1da   :  { %v2909_v12 = vrot.slane %v2908_v30, 2  ;;  %v2917_v63 = vadd.f32 %v2916_v11, %v2915_v18  ;;  %v3964_v19 = vpop.f32.mrf.mxu1  ;;  %v2630_v28 = vmax.f32 %v4983_v46, 0.0  ;;  %v2525_v46 = vmax.f32 %v4684_v25, 0.0 }
 0x1db   :  { %v3164_v11 = vadd.f32 %v3163_v38, %v3162_v29  ;;  %v2528_v25 = vmax.f32 %v4695_v39, 0.0  ;;  %v2531_v39 = vmax.f32 %v4701_v47, 0.0 }
 0x1dc   :  { %v2910_v62 = vadd.f32 %v2909_v12, %v2908_v30  ;;  %v2919_v53 = vadd.f32 %v2918_v23, %v2917_v63  ;;  %v3165_v12 = vsel %vm2636_vm2, %v2627_v13, 0.0  ;;  %v2628_v63 = vmax.f32 %v2349_v32, 0.0 }
 0x1dd   :  { %v3166_v23 = vadd.f32 %v3165_v12, %v3164_v11  ;;  %v3171_v29 = vsel %vm2636_vm2, %v2630_v28, 0.0  ;;  %v2946_v11 = vsel %vm2636_vm2, %v2525_v46, 0.0 }
 0x1de   :  { %v2911_v44 = vrot.slane %v2910_v62, 1  ;;  %v2921_v6 = vadd.f32 %v2920_v60, %v2919_v53  ;;  %v3167_v15 = vsel %vm2636_vm2, %v2628_v63, 0.0  ;;  %v2629_v53 = vmax.f32 %v2352_v48, 0.0 }
 0x1df   :  { %v2521_v60 = vmax.f32 %v4653_v59, 0.0  ;;  %v3168_v31 = vadd.f32 %v3167_v15, %v3166_v23  ;;  %v2940_v59 = vsel %vm2636_vm2, %v2522_v26, 0.0  ;;  %v2634_v15 = vmax.f32 %v3964_v19, 0.0 }
 0x1e0   :  { %v2912_v49 = vadd.f32 %v2911_v44, %v2910_v62  ;;  %v2923_v22 = vadd.f32 %v2922_v9, %v2921_v6  ;;  %v2523_v9 = vmax.f32 %v4641_v51, 0.0  ;;  %v2526_v51 = vmax.f32 %v4657_v3, 0.0 }
 0x1e1   :  { %v2938_v32 = vsel %vm2636_vm2, %v2521_v60, 0.0  ;;  %v2532_v26 = vmax.f32 %v4723_v7, 0.0  ;;  %v2533_v19 = vmax.f32 %v4738_v24, 0.0  ;;  %v2535_v7 = vmax.f32 %v4729_v17, 0.0 }
 0x1e2   :  { %v3192_v41 = vmul.f32 0.00390625, %v2912_v49  ;;  %v2925_v5 = vadd.f32 %v2924_v21, %v2923_v22  ;;  %v2365_v49 = vpop.f32.mrf.mxu1  ;;  %v2524_v21 = vmax.f32 %v4663_v8, 0.0  ;;  %v2948_v12 = vsel %vm2636_vm2, %v2526_v51, 0.0 }
 0x1e3   :  { %v2632_v8 = vmax.f32 %v2365_v49, 0.0  ;;  %v2960_v47 = vsel %vm2636_vm2, %v2532_v26, 0.0  ;;  %v2538_v17 = vmax.f32 %v4742_v35, 0.0 }
 0x1e4   :  { %v4997_v30 = vsel %vm3220_vm6, %v3192_v41, %v4928_v55  ;;  %v2927_v18 = vadd.f32 %v2926_v52, %v2925_v5  ;;  %v2520_v55 = vmax.f32 %v4635_v45, 0.0  ;;  %v3169_v45 = vsel %vm2636_vm2, %v2629_v53, 0.0  ;;  %v3965_v38 = vpop.f32.mrf.mxu1 }
 0x1e5   :  { %v3170_v54 = vadd.f32 %v3169_v45, %v3168_v31  ;;  %v2631_v41 = vmax.f32 %v3961_v4, 0.0  ;;  %v2942_v5 = vsel %vm2636_vm2, %v2523_v9, 0.0  ;;  %v2944_v52 = vsel %vm2636_vm2, %v2524_v21, 0.0 }
 0x1e6   :  { %v2929_v43 = vadd.f32 %v2928_v20, %v2927_v18  ;;  %v2936_v6 = vsel %vm2636_vm2, %v2520_v55, 0.0  ;;  %v2527_v20 = vmax.f32 %v4669_v16, 0.0  ;;  %v2368_v4 = vpop.f32.mrf.mxu1  ;;  %v3175_v3 = vsel %vm2636_vm2, %v2632_v8, 0.0 }
 0x1e7   :  { %v3172_v2 = vadd.f32 %v3171_v29, %v3170_v54  ;;  %v3173_v58 = vsel %vm2636_vm2, %v2631_v41, 0.0  ;;  %v2530_v16 = vmax.f32 %v4689_v33, 0.0  ;;  %v2952_v55 = vsel %vm2636_vm2, %v2528_v25, 0.0 }
 0x1e8   :  { %v2931_v34 = vadd.f32 %v2930_v1, %v2929_v43  ;;  %v2633_v1 = vmax.f32 %v2368_v4, 0.0  ;;  %v2950_v48 = vsel %vm2636_vm2, %v2527_v20, 0.0  ;;  %v3179_v33 = vsel %vm2636_vm2, %v2634_v15, 0.0 }
 0x1e9   :  { %v3174_v63 = vadd.f32 %v3173_v58, %v3172_v2  ;;  %v2635_v31 = vmax.f32 %v3965_v38, 0.0  ;;  %v2534_v45 = vmax.f32 %v4717_v0, 0.0  ;;  %v2536_v54 = vmax.f32 %v4747_v42, 0.0 }
 0x1ea   :  { %v2933_v62 = vadd.f32 %v2932_v37, %v2931_v34  ;;  %v2529_v34 = vmax.f32 %v4713_v56, 0.0  ;;  %v3177_v53 = vsel %vm2636_vm2, %v2633_v1, 0.0  ;;  %v2966_v29 = vsel %vm2636_vm2, %v2535_v7, 0.0 }
 0x1eb   :  { %v3176_v23 = vadd.f32 %v3175_v3, %v3174_v63  ;;  %v2964_v21 = vsel %vm2636_vm2, %v2534_v45, 0.0  ;;  %v2537_v0 = vmax.f32 %v4756_v57, 0.0  ;;  %v3045_v41 = vrot.slane %v4835_v10, 4 }
 0x1ec   :  { %v2935_v44 = vadd.f32 %v2934_v36, %v2933_v62  ;;  %v2954_v36 = vsel %vm2636_vm2, %v2529_v34, 0.0  ;;  %v2968_v38 = vsel %vm2636_vm2, %v2536_v54, 0.0  ;;  %v2972_v58 = vsel %vm2636_vm2, %v2538_v17, 0.0 }
 0x1ed   :  { %v3178_v56 = vadd.f32 %v3177_v53, %v3176_v23  ;;  %v2970_v42 = vsel %vm2636_vm2, %v2537_v0, 0.0  ;;  %v3046_v2 = vadd.f32 %v3045_v41, %v4835_v10 }
 0x1ee   :  { %v2937_v27 = vadd.f32 %v2936_v6, %v2935_v44  ;;  %v2956_v44 = vsel %vm2636_vm2, %v2530_v16, 0.0 }
 0x1ef   :  { %v3180_v9 = vadd.f32 %v3179_v33, %v3178_v56  ;;  %v3047_v35 = vrot.slane %v3046_v2, 2 }
 0x1f0   :  { %v2939_v22 = vadd.f32 %v2938_v32, %v2937_v27  ;;  %v2958_v27 = vsel %vm2636_vm2, %v2531_v39, 0.0  ;;  %v3181_v32 = vsel %vm2636_vm2, %v2635_v31, 0.0 }
 0x1f1   :  { %v3048_v63 = vadd.f32 %v3047_v35, %v3046_v2 }
 0x1f2   :  { %v2941_v40 = vadd.f32 %v2940_v59, %v2939_v22  ;;  %v2962_v22 = vsel %vm2636_vm2, %v2533_v19, 0.0 }
 0x1f3   :  { %v3049_v10 = vrot.slane %v3048_v63, 1 }
 0x1f4   :  { %v2943_v13 = vadd.f32 %v2942_v5, %v2941_v40  ;;  %v3182_v40 = vadd.f32 %v3181_v32, %v3180_v9  ;;  %v3114_v5 = vrot.slane %v4908_v61, 4 }
 0x1f5   :  { %v3050_v16 = vadd.f32 %v3049_v10, %v3048_v63 }
 0x1f6   :  { %v2945_v18 = vadd.f32 %v2944_v52, %v2943_v13  ;;  %v3183_v13 = vrot.slane %v3182_v40, 4  ;;  %v2539_v52 = vmax.f32 %v4753_v50, 0.0 }
 0x1f7   :  { %v3194_v53 = vmul.f32 0.00390625, %v3050_v16 }
 0x1f8   :  { %v2947_v43 = vadd.f32 %v2946_v11, %v2945_v18  ;;  %v3115_v18 = vadd.f32 %v3114_v5, %v4908_v61  ;;  %v3184_v8 = vadd.f32 %v3183_v13, %v3182_v40  ;;  %v2974_v11 = vsel %vm2636_vm2, %v2539_v52, 0.0 }
 0x1fa   :  { %v2949_v14 = vadd.f32 %v2948_v12, %v2947_v43  ;;  %v3116_v4 = vrot.slane %v3115_v18, 2  ;;  %v3185_v12 = vrot.slane %v3184_v8, 2 }
 0x1fc   :  { %v2951_v37 = vadd.f32 %v2950_v48, %v2949_v14  ;;  %v3117_v50 = vadd.f32 %v3116_v4, %v3115_v18  ;;  %v3186_v3 = vadd.f32 %v3185_v12, %v3184_v8 }
 0x1fe   :  { %v2953_v62 = vadd.f32 %v2952_v55, %v2951_v37  ;;  %v3118_v48 = vrot.slane %v3117_v50, 1  ;;  %v3187_v34 = vrot.slane %v3186_v3, 1 }
 0x200   :  { %v2955_v60 = vadd.f32 %v2954_v36, %v2953_v62  ;;  %v3119_v55 = vadd.f32 %v3118_v48, %v3117_v50  ;;  %v3188_v62 = vadd.f32 %v3187_v34, %v3186_v3 }
 0x202   :  { %v2957_v6 = vadd.f32 %v2956_v44, %v2955_v60  ;;  %v3195_v39 = vmul.f32 0.00390625, %v3119_v55  ;;  %v3196_v60 = vmul.f32 0.00390625, %v3188_v62 }
 0x204   :  { %v2959_v28 = vadd.f32 %v2958_v27, %v2957_v6  ;;  %v3566_v6 = vld [vmem:[%s5070_s3] ss:$0 sm:$0xff] }
 0x206   :  { %v2961_v49 = vadd.f32 %v2960_v47, %v2959_v28 }
 0x208   :  { %v2963_v59 = vadd.f32 %v2962_v22, %v2961_v49 }
 0x20a   :  { %v2965_v24 = vadd.f32 %v2964_v21, %v2963_v59 }
 0x20c   :  { %v2967_v46 = vadd.f32 %v2966_v29, %v2965_v24 }
 0x20e   :  { %v2969_v51 = vadd.f32 %v2968_v38, %v2967_v46 }
 0x210   :  { %v2971_v57 = vadd.f32 %v2970_v42, %v2969_v51 }
 0x212   :  { %v2973_v20 = vadd.f32 %v2972_v58, %v2971_v57 }
 0x214   :  { %v2975_v43 = vadd.f32 %v2974_v11, %v2973_v20 }
 0x216   :  { %v2976_v25 = vrot.slane %v2975_v43, 4 }
 0x218   :  { %v2977_v14 = vadd.f32 %v2976_v25, %v2975_v43 }
 0x21a   :  { %v2978_v1 = vrot.slane %v2977_v14, 2 }
 0x21c   :  { %v2979_v61 = vadd.f32 %v2978_v1, %v2977_v14 }
 0x21e   :  { %v2980_v37 = vrot.slane %v2979_v61, 1 }
 0x220   :  { %v2981_v23 = vadd.f32 %v2980_v37, %v2979_v61 }
 0x222   :  { %v3193_v15 = vmul.f32 0.00390625, %v2981_v23 }
 0x224   :  { %v3223_v36 = vsel %vm3222_vm7, %v3193_v15, %v4997_v30 }
 0x225   :  { %v3225_v44 = vsel %vm3224_vm8, %v3194_v53, %v3223_v36 }
 0x226   :  { %v3227_v26 = vsel %vm3226_vm9, %v3195_v39, %v3225_v44 }
 0x227   :  { %v3229_v56 = vsel %vm3228_vm10, %v3196_v60, %v3227_v26 }
 0x228   :  { %3975 = vmatmul.mubr.msk.f32.vlgmr.msra.gmra.mxu1 %vm2636_vm2, %v3229_v56 }
 0x2e8   :  { %v3298_v33 = vpop.f32.mrf.mxu1 }
 0x2e9   :  { %v3299_v31 = vadd.f32 %v3566_v6, %v3298_v33 }
 0x2ea   :  { %v3976_v27 = vpop.f32.mrf.mxu1 }
 0x2eb   :  { %3302 = vst [vmem:[%s5071_s4] sm:$0xff] %v3299_v31 }

</bundles_post_ra>
